<compile_context>
chip_gen: v7x
topology: tpu7x:2x2x1
jax: 0.10.0
libtpu: 0.0.40
codegen_flags: <defaults>
</compile_context>

<pallas_src>
import math

import jax
import jax.numpy as jnp
from jax import lax
from jax.experimental import pallas as pl
from jax.experimental.pallas import tpu as pltpu

_BN_EPS = 1e-5
_NORM_EPS = 1e-12  # F.normalize default eps

_VMEM_SPEC = pl.BlockSpec(memory_space=pltpu.MemorySpace.VMEM)


# ----------------------------------------------------------------------------
# Fused kernel factory.
#
# Inputs (refs, in order):
#   f_0..f_{M-1}   : (N, C_i, H_i*W_i)  backbone feature maps
#   w_0..w_{M-1}   : (C_i, E)           folded fc weight rows (BN1/BN2/1/HW folded)
#   bias           : (1, E)             folded fc bias
#  [w_arc_n        : (E, C)             pre-normalized ArcFace weight (transposed)]
#  [labels         : (N, 1) int32]
# Outputs:
#  [arc_out        : (N, C)]
#   emb            : (N, E)
# ----------------------------------------------------------------------------
def _make_fused_kernel(num_maps, with_labels, s=30.0, m=0.5):
    cos_m = math.cos(m)
    sin_m = math.sin(m)
    th = math.cos(math.pi - m)
    mm = math.sin(math.pi - m) * m

    def _fc_part(refs):
        # GAP -> (folded) concat+BN1+Dropout(id)+Linear+BN2, as M small dots.
        feat_refs = refs[:num_maps]
        w_refs = refs[num_maps:2 * num_maps]
        bias_ref = refs[2 * num_maps]
        acc = None
        for f_ref, w_ref in zip(feat_refs, w_refs):
            pooled = jnp.sum(f_ref[...], axis=-1)        # (N, C_i); 1/HW folded in w
            part = jnp.dot(pooled, w_ref[...],
                           preferred_element_type=jnp.float32)
            acc = part if acc is None else acc + part
        return acc + bias_ref[...]                       # (N, E)

    if not with_labels:
        def kernel_emb_only(*refs):
            emb_ref = refs[-1]
            emb_ref[...] = _fc_part(refs[:-1])
        return kernel_emb_only

    def kernel_labeled(*refs):
        arc_ref, emb_ref = refs[-2], refs[-1]
        in_refs = refs[:-2]
        warc_ref = in_refs[2 * num_maps + 1]
        label_ref = in_refs[2 * num_maps + 2]

        emb = _fc_part(in_refs)                          # (N, E)
        emb_ref[...] = emb

        # F.normalize(input): per-row L2 norm via rsqrt (EUP), no divide.
        sq = jnp.sum(emb * emb, axis=-1, keepdims=True)
        inv = lax.rsqrt(jnp.maximum(sq, _NORM_EPS * _NORM_EPS))
        emb_n = emb * inv

        # Weight already normalized (hoisted, constant per forward).
        cosine = jnp.dot(emb_n, warc_ref[...],
                         preferred_element_type=jnp.float32)   # (N, C)
        sine = jnp.sqrt(jnp.clip(1.0 - cosine * cosine, 0.0, 1.0))
        phi = cosine * cos_m - sine * sin_m
        phi = jnp.where(cosine > th, phi, cosine - mm)   # easy_margin=False

        n, c = cosine.shape
        class_ids = lax.broadcasted_iota(jnp.int32, (n, c), 1)
        one_hot = (class_ids == label_ref[...]).astype(cosine.dtype)
        # ls_eps == 0.0 -> no label smoothing branch.
        arc_ref[...] = (one_hot * phi + (1.0 - one_hot) * cosine) * s

    return kernel_labeled


def _cost_estimate(feats, e, num_classes, with_arc):
    n = feats[0].shape[0]
    flops = 0
    bytes_accessed = 0
    for f in feats:
        _, ci, hw = f.shape
        flops += n * ci * hw                 # GAP reductions
        flops += 2 * n * ci * e              # per-group dot
        bytes_accessed += (n * ci * hw + ci * e) * 4
    flops += n * e                           # bias add
    bytes_accessed += (e + n * e) * 4        # bias in + emb out
    transcendentals = 0
    if with_arc:
        flops += 2 * n * e * num_classes + 10 * n * num_classes + 4 * n * e
        transcendentals = n + n * num_classes        # rsqrt + sqrt
        bytes_accessed += (e * num_classes + n + n * num_classes) * 4
    return pl.CostEstimate(flops=int(flops),
                           transcendentals=int(transcendentals),
                           bytes_accessed=int(bytes_accessed))


# ----------------------------------------------------------------------------
# Full forward (HappyWhaleModel.forward starting at the feature-map list).
# ----------------------------------------------------------------------------
def happy_whale_forward(feature_maps, params, labels=None):
    n = feature_maps[0].shape[0]
    feats = [f.reshape(n, f.shape[1], f.shape[2] * f.shape[3])
             for f in feature_maps]
    num_maps = len(feats)
    w_pieces = params["fc_w_pieces"]
    bias = params["fc_bias"]                 # (1, E)
    e = bias.shape[1]

    if labels is None:
        num_in = 2 * num_maps + 1
        return pl.pallas_call(
            _make_fused_kernel(num_maps, with_labels=False),
            out_shape=jax.ShapeDtypeStruct((n, e), jnp.float32),
            in_specs=[_VMEM_SPEC] * num_in,
            out_specs=_VMEM_SPEC,
            cost_estimate=_cost_estimate(feats, e, 0, with_arc=False),
        )(*feats, *w_pieces, bias)

    w_arc_n = params["arc_w_n"]              # (E, C), pre-normalized
    c = w_arc_n.shape[1]
    labels2d = labels.reshape(n, 1).astype(jnp.int32)
    num_in = 2 * num_maps + 3
    arc_out, emb = pl.pallas_call(
        _make_fused_kernel(num_maps, with_labels=True, s=30.0, m=0.5),
        out_shape=(jax.ShapeDtypeStruct((n, c), jnp.float32),
                   jax.ShapeDtypeStruct((n, e), jnp.float32)),
        in_specs=[_VMEM_SPEC] * num_in,
        out_specs=(_VMEM_SPEC, _VMEM_SPEC),
        cost_estimate=_cost_estimate(feats, e, c, with_arc=True),
    )(*feats, *w_pieces, bias, w_arc_n, labels2d)
    return arc_out, emb


# ----------------------------------------------------------------------------
# Parameter construction (deterministic, synthetic) + inference-time folding.
# ----------------------------------------------------------------------------
def init_params(key, feat_channels, feat_hw, embedding_size, num_classes):
    in_features = sum(feat_channels)
    ks = jax.random.split(key, 10)

    def bn_raw(kg, kb, km, kv, dim):
        gamma = 1.0 + 0.1 * jax.random.normal(kg, (dim,), jnp.float32)
        beta = 0.1 * jax.random.normal(kb, (dim,), jnp.float32)
        mean = 0.1 * jax.random.normal(km, (dim,), jnp.float32)
        var = 1.0 + 0.1 * jax.random.uniform(kv, (dim,), jnp.float32)
        return gamma, beta, mean, var

    g1, be1, m1, v1 = bn_raw(ks[0], ks[1], ks[2], ks[3], in_features)
    g2, be2, m2, v2 = bn_raw(ks[4], ks[5], ks[6], ks[7], embedding_size)

    # nn.Linear(in_features, embedding_size) weight passed transposed (F, E).
    lin_bound = 1.0 / math.sqrt(in_features)
    w_lin = jax.random.uniform(ks[8], (in_features, embedding_size),
                               jnp.float32, -lin_bound, lin_bound)
    b_lin = jnp.zeros((embedding_size,), jnp.float32)

    # ArcMarginProduct weight (C, E), xavier_uniform, used transposed (E, C).
    xav = math.sqrt(6.0 / (embedding_size + num_classes))
    w_arc_t = jax.random.uniform(ks[9], (embedding_size, num_classes),
                                 jnp.float32, -xav, xav)

    # ---- inference-time constant folding (hoisted out of the kernel) ----
    # BN1(x) -> Dropout(id) -> Linear -> BN2  ==  x @ W_fold + bias_fold
    s1 = g1 / jnp.sqrt(v1 + _BN_EPS)
    bb1 = be1 - m1 * s1
    s2 = g2 / jnp.sqrt(v2 + _BN_EPS)
    bb2 = be2 - m2 * s2
    w_fold = (s1[:, None] * w_lin) * s2[None, :]                # (F, E)
    bias_fold = ((bb1 @ w_lin) + b_lin) * s2 + bb2               # (E,)

    # Split W_fold per feature-map channel group and fold 1/(H*W) so the
    # kernel only needs sum-over-spatial + dot (GAP/concat/BN fused away).
    pieces = []
    off = 0
    for ci, hw in zip(feat_channels, feat_hw):
        pieces.append(w_fold[off:off + ci, :] / float(hw))       # (C_i, E)
        off += ci

    # ArcFace weight normalization hoisted out of the kernel: per-class row
    # norm of (C, E) == per-column norm of the (E, C) transpose.
    wnorm = jnp.sqrt(jnp.sum(w_arc_t * w_arc_t, axis=0, keepdims=True))
    w_arc_n = w_arc_t / jnp.maximum(wnorm, _NORM_EPS)

    return dict(
        fc_w_pieces=tuple(pieces),
        fc_bias=bias_fold.reshape(1, embedding_size),
        arc_w_n=w_arc_n,
        # raw params kept only for the pure-JAX reference check below
        raw=dict(bn1=(g1, be1, m1, v1), bn2=(g2, be2, m2, v2),
                 w_lin=w_lin, b_lin=b_lin, arc_w_t=w_arc_t),
    )


# ----------------------------------------------------------------------------
# Pure-JAX reference (mirrors the PyTorch module, inference mode).
# ----------------------------------------------------------------------------
def reference_forward(feature_maps, params, labels, s=30.0, m=0.5):
    raw = params["raw"]
    n = feature_maps[0].shape[0]
    pooled = [jnp.mean(f.reshape(n, f.shape[1], -1), axis=-1)
              for f in feature_maps]
    x = jnp.concatenate(pooled, axis=1)

    g1, be1, m1, v1 = raw["bn1"]
    x = (x - m1) / jnp.sqrt(v1 + _BN_EPS) * g1 + be1
    emb = jnp.dot(x, raw["w_lin"], precision=lax.Precision.HIGHEST) + raw["b_lin"]
    g2, be2, m2, v2 = raw["bn2"]
    emb = (emb - m2) / jnp.sqrt(v2 + _BN_EPS) * g2 + be2

    emb_n = emb / jnp.maximum(
        jnp.linalg.norm(emb, axis=-1, keepdims=True), _NORM_EPS)
    w_t = raw["arc_w_t"]
    w_n = w_t / jnp.maximum(
        jnp.linalg.norm(w_t, axis=0, keepdims=True), _NORM_EPS)
    cosine = jnp.dot(emb_n, w_n, precision=lax.Precision.HIGHEST)
    sine = jnp.sqrt(jnp.clip(1.0 - cosine * cosine, 0.0, 1.0))
    cos_m, sin_m = math.cos(m), math.sin(m)
    th, mm = math.cos(math.pi - m), math.sin(math.pi - m) * m
    phi = cosine * cos_m - sine * sin_m
    phi = jnp.where(cosine > th, phi, cosine - mm)
    one_hot = jax.nn.one_hot(labels, cosine.shape[1], dtype=cosine.dtype)
    return (one_hot * phi + (1.0 - one_hot) * cosine) * s, emb


if __name__ == "__main__":
    key = jax.random.PRNGKey(0)

    batch = 8
    feat_channels = (8, 16, 32, 72)       # sums to in_features = 128
    feat_spatial = (16, 8, 4, 2)          # backbone pyramid resolutions
    feat_hw = tuple(sp * sp for sp in feat_spatial)
    embedding_size = 64
    num_classes = 16

    kf = jax.random.split(key, len(feat_channels) + 2)
    feature_maps = [
        jax.random.normal(kf[i], (batch, c, sp, sp), jnp.float32)
        for i, (c, sp) in enumerate(zip(feat_channels, feat_spatial))
    ]
    labels = jax.random.randint(kf[-2], (batch,), 0, num_classes, jnp.int32)
    params = init_params(kf[-1], feat_channels, feat_hw,
                         embedding_size, num_classes)

    arc_out, emb = happy_whale_forward(feature_maps, params, labels)
    emb_only = happy_whale_forward(feature_maps, params, labels=None)
    jax.block_until_ready((arc_out, emb, emb_only))

    assert arc_out.shape == (batch, num_classes)
    assert emb.shape == (batch, embedding_size)
    assert emb_only.shape == (batch, embedding_size)

    # Smoke-check numerics against an unfolded pure-JAX reference.
    ref_arc, ref_emb = reference_forward(feature_maps, params, labels)
    assert float(jnp.max(jnp.abs(emb - ref_emb))) < 5e-2, "emb mismatch"
    assert float(jnp.max(jnp.abs(emb_only - ref_emb))) < 5e-2, "emb-only mismatch"
    assert float(jnp.max(jnp.abs(arc_out - ref_arc))) < 5e-1, "arc mismatch"

    print("KERNEL_OK")
</pallas_src>

<mosaic_0001>
module attributes {stable_mosaic.version = 11 : i64} {
  func.func @kernel_labeled(%arg0: memref<8x8x256xf32, #tpu.memory_space<vmem>>, %arg1: memref<8x16x64xf32, #tpu.memory_space<vmem>>, %arg2: memref<8x32x16xf32, #tpu.memory_space<vmem>>, %arg3: memref<8x72x4xf32, #tpu.memory_space<vmem>>, %arg4: memref<8x64xf32, #tpu.memory_space<vmem>>, %arg5: memref<16x64xf32, #tpu.memory_space<vmem>>, %arg6: memref<32x64xf32, #tpu.memory_space<vmem>>, %arg7: memref<72x64xf32, #tpu.memory_space<vmem>>, %arg8: memref<1x64xf32, #tpu.memory_space<vmem>>, %arg9: memref<64x16xf32, #tpu.memory_space<vmem>>, %arg10: memref<8x1xi32, #tpu.memory_space<vmem>>, %arg11: memref<8x16xf32, #tpu.memory_space<vmem>>, %arg12: memref<8x64xf32, #tpu.memory_space<vmem>>) attributes {dimension_semantics = [], scalar_prefetch = 0 : i64, scratch_operands = 0 : i64, tpu.core_type = #tpu.core_type<tc>} {
    %c0 = arith.constant 0 : index
    %c0_0 = arith.constant 0 : index
    %c0_1 = arith.constant 0 : index
    %0 = vector.load %arg0[%c0, %c0_0, %c0_1] : memref<8x8x256xf32, #tpu.memory_space<vmem>>, vector<8x8x256xf32>
    %cst = arith.constant dense<0.000000e+00> : vector<8x8xf32>
    %1 = vector.multi_reduction <add>, %0, %cst [2] : vector<8x8x256xf32> to vector<8x8xf32>
    %c0_2 = arith.constant 0 : index
    %c0_3 = arith.constant 0 : index
    %2 = vector.load %arg4[%c0_2, %c0_3] : memref<8x64xf32, #tpu.memory_space<vmem>>, vector<8x64xf32>
    %cst_4 = arith.constant dense<0.000000e+00> : vector<8x64xf32>
    %3 = tpu.matmul %1, %2, %cst_4 {dimension_numbers = #tpu.dot_dimension_numbers<[1], [0], [0], [1], [0, 0, 1, 1], [], []>} : vector<8x8xf32>, vector<8x64xf32>, vector<8x64xf32> -> vector<8x64xf32>
    %c0_5 = arith.constant 0 : index
    %c0_6 = arith.constant 0 : index
    %c0_7 = arith.constant 0 : index
    %4 = vector.load %arg1[%c0_5, %c0_6, %c0_7] : memref<8x16x64xf32, #tpu.memory_space<vmem>>, vector<8x16x64xf32>
    %cst_8 = arith.constant dense<0.000000e+00> : vector<8x16xf32>
    %5 = vector.multi_reduction <add>, %4, %cst_8 [2] : vector<8x16x64xf32> to vector<8x16xf32>
    %c0_9 = arith.constant 0 : index
    %c0_10 = arith.constant 0 : index
    %6 = vector.load %arg5[%c0_9, %c0_10] : memref<16x64xf32, #tpu.memory_space<vmem>>, vector<16x64xf32>
    %cst_11 = arith.constant dense<0.000000e+00> : vector<8x64xf32>
    %7 = tpu.matmul %5, %6, %cst_11 {dimension_numbers = #tpu.dot_dimension_numbers<[1], [0], [0], [1], [0, 0, 1, 1], [], []>} : vector<8x16xf32>, vector<16x64xf32>, vector<8x64xf32> -> vector<8x64xf32>
    %8 = arith.addf %3, %7 : vector<8x64xf32>
    %c0_12 = arith.constant 0 : index
    %c0_13 = arith.constant 0 : index
    %c0_14 = arith.constant 0 : index
    %9 = vector.load %arg2[%c0_12, %c0_13, %c0_14] : memref<8x32x16xf32, #tpu.memory_space<vmem>>, vector<8x32x16xf32>
    %cst_15 = arith.constant dense<0.000000e+00> : vector<8x32xf32>
    %10 = vector.multi_reduction <add>, %9, %cst_15 [2] : vector<8x32x16xf32> to vector<8x32xf32>
    %c0_16 = arith.constant 0 : index
    %c0_17 = arith.constant 0 : index
    %11 = vector.load %arg6[%c0_16, %c0_17] : memref<32x64xf32, #tpu.memory_space<vmem>>, vector<32x64xf32>
    %cst_18 = arith.constant dense<0.000000e+00> : vector<8x64xf32>
    %12 = tpu.matmul %10, %11, %cst_18 {dimension_numbers = #tpu.dot_dimension_numbers<[1], [0], [0], [1], [0, 0, 1, 1], [], []>} : vector<8x32xf32>, vector<32x64xf32>, vector<8x64xf32> -> vector<8x64xf32>
    %13 = arith.addf %8, %12 : vector<8x64xf32>
    %c0_19 = arith.constant 0 : index
    %c0_20 = arith.constant 0 : index
    %c0_21 = arith.constant 0 : index
    %14 = vector.load %arg3[%c0_19, %c0_20, %c0_21] : memref<8x72x4xf32, #tpu.memory_space<vmem>>, vector<8x72x4xf32>
    %cst_22 = arith.constant dense<0.000000e+00> : vector<8x72xf32>
    %15 = vector.multi_reduction <add>, %14, %cst_22 [2] : vector<8x72x4xf32> to vector<8x72xf32>
    %c0_23 = arith.constant 0 : index
    %c0_24 = arith.constant 0 : index
    %16 = vector.load %arg7[%c0_23, %c0_24] : memref<72x64xf32, #tpu.memory_space<vmem>>, vector<72x64xf32>
    %cst_25 = arith.constant dense<0.000000e+00> : vector<8x64xf32>
    %17 = tpu.matmul %15, %16, %cst_25 {dimension_numbers = #tpu.dot_dimension_numbers<[1], [0], [0], [1], [0, 0, 1, 1], [], []>} : vector<8x72xf32>, vector<72x64xf32>, vector<8x64xf32> -> vector<8x64xf32>
    %18 = arith.addf %13, %17 : vector<8x64xf32>
    %c0_26 = arith.constant 0 : index
    %c0_27 = arith.constant 0 : index
    %19 = vector.load %arg8[%c0_26, %c0_27] : memref<1x64xf32, #tpu.memory_space<vmem>>, vector<1x64xf32>
    %20 = vector.broadcast %19 : vector<1x64xf32> to vector<8x64xf32>
    %21 = arith.addf %18, %20 : vector<8x64xf32>
    %c0_28 = arith.constant 0 : index
    %c0_29 = arith.constant 0 : index
    %22 = vector.load %arg12[%c0_28, %c0_29] : memref<8x64xf32, #tpu.memory_space<vmem>>, vector<8x64xf32>
    tpu.vector_store %arg12[%c0_28, %c0_29], %21 {strides = array<i32>} : memref<8x64xf32, #tpu.memory_space<vmem>>, vector<8x64xf32>,
    %23 = arith.mulf %21, %21 : vector<8x64xf32>
    %cst_30 = arith.constant dense<0.000000e+00> : vector<8xf32>
    %24 = vector.multi_reduction <add>, %23, %cst_30 [1] : vector<8x64xf32> to vector<8xf32>
    %25 = vector.shape_cast %24 : vector<8xf32> to vector<8x1xf32>
    %cst_31 = arith.constant 1.000000e-24 : f32
    %26 = vector.broadcast %cst_31 : f32 to vector<8x1xf32>
    %27 = arith.maximumf %25, %26 : vector<8x1xf32>
    %28 = math.rsqrt %27 : vector<8x1xf32>
    %29 = vector.broadcast %28 : vector<8x1xf32> to vector<8x64xf32>
    %30 = arith.mulf %21, %29 : vector<8x64xf32>
    %c0_32 = arith.constant 0 : index
    %c0_33 = arith.constant 0 : index
    %31 = vector.load %arg9[%c0_32, %c0_33] : memref<64x16xf32, #tpu.memory_space<vmem>>, vector<64x16xf32>
    %cst_34 = arith.constant dense<0.000000e+00> : vector<8x16xf32>
    %32 = tpu.matmul %30, %31, %cst_34 {dimension_numbers = #tpu.dot_dimension_numbers<[1], [0], [0], [1], [0, 0, 1, 1], [], []>} : vector<8x64xf32>, vector<64x16xf32>, vector<8x16xf32> -> vector<8x16xf32>
    %33 = arith.mulf %32, %32 : vector<8x16xf32>
    %cst_35 = arith.constant 1.000000e+00 : f32
    %34 = vector.broadcast %cst_35 : f32 to vector<8x16xf32>
    %35 = arith.subf %34, %33 : vector<8x16xf32>
    %cst_36 = arith.constant 0.000000e+00 : f32
    %cst_37 = arith.constant 1.000000e+00 : f32
    %36 = vector.broadcast %cst_36 : f32 to vector<8x16xf32>
    %37 = arith.maximumf %36, %35 : vector<8x16xf32>
    %38 = vector.broadcast %cst_37 : f32 to vector<8x16xf32>
    %39 = arith.minimumf %38, %37 : vector<8x16xf32>
    %40 = math.sqrt %39 : vector<8x16xf32>
    %cst_38 = arith.constant 0.87758255 : f32
    %41 = vector.broadcast %cst_38 : f32 to vector<8x16xf32>
    %42 = arith.mulf %32, %41 : vector<8x16xf32>
    %cst_39 = arith.constant 0.47942555 : f32
    %43 = vector.broadcast %cst_39 : f32 to vector<8x16xf32>
    %44 = arith.mulf %40, %43 : vector<8x16xf32>
    %45 = arith.subf %42, %44 : vector<8x16xf32>
    %cst_40 = arith.constant -0.87758255 : f32
    %46 = vector.broadcast %cst_40 : f32 to vector<8x16xf32>
    %47 = arith.cmpf ogt, %32, %46 : vector<8x16xf32>
    %cst_41 = arith.constant 0.239712775 : f32
    %48 = vector.broadcast %cst_41 : f32 to vector<8x16xf32>
    %49 = arith.subf %32, %48 : vector<8x16xf32>
    %50 = arith.select %47, %45, %49 : vector<8x16xi1>, vector<8x16xf32>
    %51 = tpu.iota {dimensions = array<i32: 1>} : vector<8x16xi32>
    %c0_42 = arith.constant 0 : index
    %c0_43 = arith.constant 0 : index
    %52 = vector.load %arg10[%c0_42, %c0_43] : memref<8x1xi32, #tpu.memory_space<vmem>>, vector<8x1xi32>
    %53 = vector.broadcast %52 : vector<8x1xi32> to vector<8x16xi32>
    %54 = arith.cmpi eq, %51, %53 : vector<8x16xi32>
    %55 = arith.extui %54 : vector<8x16xi1> to vector<8x16xi32>
    %56 = arith.sitofp %55 : vector<8x16xi32> to vector<8x16xf32>
    %57 = arith.mulf %56, %50 : vector<8x16xf32>
    %cst_44 = arith.constant 1.000000e+00 : f32
    %58 = vector.broadcast %cst_44 : f32 to vector<8x16xf32>
    %59 = arith.subf %58, %56 : vector<8x16xf32>
    %60 = arith.mulf %59, %32 : vector<8x16xf32>
    %61 = arith.addf %57, %60 : vector<8x16xf32>
    %cst_45 = arith.constant 3.000000e+01 : f32
    %62 = vector.broadcast %cst_45 : f32 to vector<8x16xf32>
    %63 = arith.mulf %61, %62 : vector<8x16xf32>
    %c0_46 = arith.constant 0 : index
    %c0_47 = arith.constant 0 : index
    %64 = vector.load %arg11[%c0_46, %c0_47] : memref<8x16xf32, #tpu.memory_space<vmem>>, vector<8x16xf32>
    tpu.vector_store %arg11[%c0_46, %c0_47], %63 {strides = array<i32>} : memref<8x16xf32, #tpu.memory_space<vmem>>, vector<8x16xf32>,
    return
  }
}

</mosaic_0001>

<bundles_post_ra>
// kernel: tpu_custom_call.1
= control target key start
LH: loop header
LB: loop body
LE: loop exit
PB: predicated region body
PF: predicated region fallthrough
CT: control target
= control target key end

     0   :  { %18 = vsyncpa [#allocation3], 0  ;;  %vm3147_vm0 = vcmask 523264   ;;  %s3133_s0 = inlined_call_operand.vmem [shape: f32[8,8,256], index: 0, kind: input, shape index: {}]   ;;  %s3134_s1 = inlined_call_operand.vmem [shape: f32[8,16,64], index: 1, kind: input, shape index: {}]   ;;  %s3135_s2 = inlined_call_operand.vmem [shape: f32[8,32,16], index: 2, kind: input, shape index: {}]   ;;  %s3136_s3 = inlined_call_operand.vmem [shape: f32[8,72,4], index: 3, kind: input, shape index: {}]   ;;  %s3137_s4 = inlined_call_operand.vmem [shape: f32[8,64], index: 4, kind: input, shape index: {}]   ;;  %s3138_s5 = inlined_call_operand.vmem [shape: f32[16,64], index: 5, kind: input, shape index: {}]   ;;  %s3139_s6 = inlined_call_operand.vmem [shape: f32[32,64], index: 6, kind: input, shape index: {}]   ;;  %s3140_s7 = inlined_call_operand.vmem [shape: f32[72,64], index: 7, kind: input, shape index: {}]   ;;  %s3141_s8 = inlined_call_operand.vmem [shape: f32[1,64], index: 8, kind: input, shape index: {}]   ;;  %s3142_s9 = inlined_call_operand.vmem [shape: f32[64,16], index: 9, kind: input, shape index: {}]   ;;  %s3143_s10 = inlined_call_operand.vmem [shape: s32[8,1], index: 10, kind: input, shape index: {}]   ;;  %s3144_s11 = inlined_call_operand.hbm [shape: f32[8,16], index: 11, kind: output, shape index: {0}]   ;;  %s3145_s12 = inlined_call_operand.hbm [shape: f32[8,64], index: 12, kind: output, shape index: {1}]  }
   0x1   :  { %v85_v0 = vld [vmem:[%s3134_s1 + $0x10] sm:$0xff]  ;;  %v83_v1 = vld [vmem:[%s3134_s1] sm:$0xff]  ;;  %v86_v2 = vld [vmem:[%s3134_s1 + $0x18] sm:$0xff] }
   0x2   :  { %v106_v3 = vsel %vm3147_vm0, %v85_v0, 0.0  ;;  %v100_v4 = vsel %vm3147_vm0, %v83_v1, 0.0  ;;  %v84_v5 = vld [vmem:[%s3134_s1 + $0x8] sm:$0xff]  ;;  %v109_v6 = vsel %vm3147_vm0, %v86_v2, 0.0  ;;  %v87_v9 = vld [vmem:[%s3134_s1 + $0x20] sm:$0xff]  ;;  %v90_v12 = vld [vmem:[%s3134_s1 + $0x38] sm:$0xff] }
   0x3   :  { %107 = vadd.xlane.f32.xlu1 %v106_v3  ;;  %101 = vadd.xlane.f32.xlu0 %v100_v4  ;;  %v103_v7 = vsel %vm3147_vm0, %v84_v5, 0.0  ;;  %v88_v8 = vld [vmem:[%s3134_s1 + $0x28] sm:$0xff]  ;;  %v112_v11 = vsel %vm3147_vm0, %v87_v9, 0.0  ;;  %v89_v13 = vld [vmem:[%s3134_s1 + $0x30] sm:$0xff]  ;;  %v121_v14 = vsel %vm3147_vm0, %v90_v12, 0.0  ;;  %v91_v17 = vld [vmem:[%s3134_s1 + $0x40] sm:$0xff] }
   0x4   :  { %v115_v10 = vsel %vm3147_vm0, %v88_v8, 0.0  ;;  %v118_v15 = vsel %vm3147_vm0, %v89_v13, 0.0  ;;  %v92_v16 = vld [vmem:[%s3134_s1 + $0x48] sm:$0xff]  ;;  %v124_v19 = vsel %vm3147_vm0, %v91_v17, 0.0  ;;  %v94_v20 = vld [vmem:[%s3134_s1 + $0x58] sm:$0xff]  ;;  %v93_v21 = vld [vmem:[%s3134_s1 + $0x50] sm:$0xff] }
   0x5   :  { %v127_v18 = vsel %vm3147_vm0, %v92_v16, 0.0  ;;  %v133_v22 = vsel %vm3147_vm0, %v94_v20, 0.0  ;;  %v130_v23 = vsel %vm3147_vm0, %v93_v21, 0.0  ;;  %v96_v24 = vld [vmem:[%s3134_s1 + $0x68] sm:$0xff]  ;;  %v95_v25 = vld [vmem:[%s3134_s1 + $0x60] sm:$0xff]  ;;  %v98_v28 = vld [vmem:[%s3134_s1 + $0x78] sm:$0xff] }
   0x6   :  { %v139_v26 = vsel %vm3147_vm0, %v96_v24, 0.0  ;;  %v136_v27 = vsel %vm3147_vm0, %v95_v25, 0.0  ;;  %v97_v29 = vld [vmem:[%s3134_s1 + $0x70] sm:$0xff]  ;;  %v145_v31 = vsel %vm3147_vm0, %v98_v28, 0.0  ;;  %v45_v33 = vld [vmem:[%s3133_s0 + $0x18] sm:$0xff]  ;;  %v42_v34 = vld [vmem:[%s3133_s0] sm:$0xff] }
   0x7   :  { %110 = vadd.xlane.f32.xlu1 %v109_v6  ;;  %104 = vadd.xlane.f32.xlu0 %v103_v7  ;;  %v44_v30 = vld [vmem:[%s3133_s0 + $0x10] sm:$0xff]  ;;  %v142_v32 = vsel %vm3147_vm0, %v97_v29, 0.0  ;;  %v43_v35 = vld [vmem:[%s3133_s0 + $0x8] sm:$0xff] }
   0x8   :  { %v61_v36 = vadd.f32 %v45_v33, %v44_v30  ;;  %v58_v37 = vadd.f32 %v43_v35, %v42_v34 }
   0xb   :  { %116 = vadd.xlane.f32.xlu1 %v115_v10  ;;  %113 = vadd.xlane.f32.xlu0 %v112_v11 }
   0xf   :  { %122 = vadd.xlane.f32.xlu1 %v121_v14  ;;  %119 = vadd.xlane.f32.xlu0 %v118_v15 }
  0x13   :  { %128 = vadd.xlane.f32.xlu1 %v127_v18  ;;  %125 = vadd.xlane.f32.xlu0 %v124_v19 }
  0x17   :  { %134 = vadd.xlane.f32.xlu1 %v133_v22  ;;  %131 = vadd.xlane.f32.xlu0 %v130_v23 }
  0x1b   :  { %140 = vadd.xlane.f32.xlu1 %v139_v26  ;;  %137 = vadd.xlane.f32.xlu0 %v136_v27 }
  0x1f   :  { %146 = vadd.xlane.f32.xlu1 %v145_v31  ;;  %143 = vadd.xlane.f32.xlu0 %v142_v32 }
  0x20   :  { %19 = vsyncpa [#allocation5], 0  ;;  %v46_v38 = vld [vmem:[%s3133_s0 + $0x20] sm:$0xff]  ;;  %v47_v39 = vld [vmem:[%s3133_s0 + $0x28] sm:$0xff]  ;;  %vm922_vm1 = vcmask 31744   ;;  %v2011_v57 = vmov 0.0|0.0  }
  0x21   :  { %v850_v40 = vld [vmem:[%s3136_s3] sm:$0xff]  ;;  %v64_v41 = vadd.f32 %v47_v39, %v46_v38  ;;  %v859_v43 = vld [vmem:[%s3136_s3 + $0x48] sm:$0xff]  ;;  %v48_v47 = vld [vmem:[%s3133_s0 + $0x30] sm:$0xff]  ;;  %1918 = vmatprep.subr.bf16.mxu0 %v2011_v57  ;;  %vm2012_vm2 = vmmov 0   ;;  %v2013_v60 = vmov 0.0   ;;  %vm3146_vm3 = vcmask 130048  }
  0x22   :  { %v923_v42 = vsel %vm922_vm1, %v850_v40, 0.0  ;;  %v851_v44 = vld [vmem:[%s3136_s3 + $0x8] sm:$0xff]  ;;  %v950_v45 = vsel %vm922_vm1, %v859_v43, 0.0  ;;  %v49_v48 = vld [vmem:[%s3133_s0 + $0x38] sm:$0xff]  ;;  %v860_v49 = vld [vmem:[%s3136_s3 + $0x50] sm:$0xff]  ;;  %1859 = vmatprep.mubr.msk.f32.mxu0 %vm2012_vm2, %v2013_v60  ;;  %1862 = vmatprep.subr.mxu1 %v2013_v60  ;;  %vm177_vm4 = vcmask 130112  }
  0x23   :  { %62 = vadd.xlane.f32.xlu1 %v61_v36  ;;  %59 = vadd.xlane.f32.xlu0 %v58_v37  ;;  %v926_v46 = vsel %vm922_vm1, %v851_v44, 0.0  ;;  %v67_v50 = vadd.f32 %v49_v48, %v48_v47  ;;  %v148_v51 = vld [vmem:[%s3138_s5] sm:$0xff]  ;;  %v149_v52 = vld [vmem:[%s3138_s5 + $0x8] sm:$0xff]  ;;  %v953_v53 = vsel %vm922_vm1, %v860_v49, 0.0  ;;  %v861_v55 = vld [vmem:[%s3136_s3 + $0x58] sm:$0xff]  ;;  %vm242_vm5 = vcmask 1041409  }
  0x24   :  { %v1919_v54 = vpack.c.bf16 %v149_v52, %v148_v51  ;;  %v852_v56 = vld [vmem:[%s3136_s3 + $0x10] sm:$0xff]  ;;  %v956_v58 = vsel %vm922_vm1, %v861_v55, 0.0  ;;  %v869_v61 = vld [vmem:[%s3136_s3 + $0x98] sm:$0xff]  ;;  %1864 = vmatprep.mubr.msk.f32.mxu1 %vm2012_vm2, %v2013_v60  ;;  %v50_v1 = vld [vmem:[%s3133_s0 + $0x40] sm:$0xff]  ;;  %vm244_vm6 = vcmask 1042434   ;;  %vm246_vm7 = vcmask 1043459  }
  0x25   :  { %v929_v59 = vsel %vm922_vm1, %v852_v56, 0.0  ;;  %v868_v62 = vld [vmem:[%s3136_s3 + $0x90] sm:$0xff]  ;;  %v980_v63 = vsel %vm922_vm1, %v869_v61, 0.0  ;;  %v51_v2 = vld [vmem:[%s3133_s0 + $0x48] sm:$0xff]  ;;  %v853_v3 = vld [vmem:[%s3136_s3 + $0x18] sm:$0xff]  ;;  %vm248_vm8 = vcmask 1044484  }
  0x26   :  { %1920 = vmatpush3.bf16.msra.mxu0 %v1919_v54  ;;  %v977_v0 = vsel %vm922_vm1, %v868_v62, 0.0  ;;  %v70_v4 = vadd.f32 %v51_v2, %v50_v1  ;;  %v932_v5 = vsel %vm922_vm1, %v853_v3, 0.0  ;;  %v870_v6 = vld [vmem:[%s3136_s3 + $0xa0] sm:$0xff]  ;;  %v877_v11 = vld [vmem:[%s3136_s3 + $0xd8] sm:$0xff]  ;;  %v52_v14 = vld [vmem:[%s3133_s0 + $0x50] sm:$0xff]  ;;  %vm250_vm9 = vcmask 1045509  }
  0x27   :  { %924 = vadd.xlane.f32.xlu1 %v923_v42  ;;  %65 = vadd.xlane.f32.xlu0 %v64_v41  ;;  %v862_v7 = vld [vmem:[%s3136_s3 + $0x60] sm:$0xff]  ;;  %v983_v8 = vsel %vm922_vm1, %v870_v6, 0.0  ;;  %v1004_v13 = vsel %vm922_vm1, %v877_v11, 0.0  ;;  %v53_v15 = vld [vmem:[%s3133_s0 + $0x58] sm:$0xff]  ;;  %v450_v20 = vld [vmem:[%s3135_s2 + $0x8] sm:$0xff]  ;;  %vm252_vm10 = vcmask 1046534  }
  0x28   :  { %1927 = vmatprep.subr.bf16.mxu0 %v2011_v57  ;;  %v959_v9 = vsel %vm922_vm1, %v862_v7, 0.0  ;;  %v878_v10 = vld [vmem:[%s3136_s3 + $0xe0] sm:$0xff]  ;;  %v73_v17 = vadd.f32 %v53_v15, %v52_v14  ;;  %v484_v22 = vsel %vm3146_vm3, %v450_v20, 0.0  ;;  %v454_v24 = vld [vmem:[%s3135_s2 + $0x28] sm:$0xff]  ;;  %v455_v40 = vld [vmem:[%s3135_s2 + $0x30] sm:$0xff]  ;;  %vm254_vm11 = vcmask 1047559  }
  0x29   :  { %v1007_v12 = vsel %vm922_vm1, %v878_v10, 0.0  ;;  %v449_v16 = vld [vmem:[%s3135_s2] sm:$0xff]  ;;  %v496_v26 = vsel %vm3146_vm3, %v454_v24, 0.0  ;;  %v871_v27 = vld [vmem:[%s3136_s3 + $0xa8] sm:$0xff]  ;;  %v451_v41 = vld [vmem:[%s3135_s2 + $0x10] sm:$0xff]  ;;  %v499_v42 = vsel %vm3146_vm3, %v455_v40, 0.0  ;;  %v166_v40 = vlaneseq }
  0x2a   :  { %v481_v18 = vsel %vm3146_vm3, %v449_v16, 0.0  ;;  %v453_v19 = vld [vmem:[%s3135_s2 + $0x20] sm:$0xff]  ;;  %v863_v28 = vld [vmem:[%s3136_s3 + $0x68] sm:$0xff]  ;;  %v986_v29 = vsel %vm922_vm1, %v871_v27, 0.0  ;;  %v487_v43 = vsel %vm3146_vm3, %v451_v41, 0.0  ;;  %v864_v48 = vld [vmem:[%s3136_s3 + $0x70] sm:$0xff] }
  0x2b   :  { %951 = vadd.xlane.f32.xlu1 %v950_v45  ;;  %927 = vadd.xlane.f32.xlu0 %v926_v46  ;;  %v493_v21 = vsel %vm3146_vm3, %v453_v19, 0.0  ;;  %v854_v23 = vld [vmem:[%s3136_s3 + $0x20] sm:$0xff]  ;;  %v962_v30 = vsel %vm922_vm1, %v863_v28, 0.0  ;;  %v879_v32 = vld [vmem:[%s3136_s3 + $0xe8] sm:$0xff]  ;;  %v880_v52 = vld [vmem:[%s3136_s3 + $0xf0] sm:$0xff]  ;;  %vm627_vm12 = vcmask 195712  }
  0x2c   :  { %v935_v25 = vsel %vm922_vm1, %v854_v23, 0.0  ;;  %v886_v31 = vld [vmem:[%s3136_s3 + $0x120] sm:$0xff]  ;;  %v1010_v34 = vsel %vm922_vm1, %v879_v32, 0.0  ;;  %v55_v36 = vld [vmem:[%s3133_s0 + $0x68] sm:$0xff]  ;;  %v1013_v54 = vsel %vm922_vm1, %v880_v52, 0.0  ;;  %v56_v62 = vld [vmem:[%s3133_s0 + $0x70] sm:$0xff] }
  0x2d   :  { %v1031_v33 = vsel %vm922_vm1, %v886_v31, 0.0  ;;  %v54_v35 = vld [vmem:[%s3133_s0 + $0x60] sm:$0xff]  ;;  %v887_v37 = vld [vmem:[%s3136_s3 + $0x128] sm:$0xff]  ;;  %v456_v3 = vld [vmem:[%s3135_s2 + $0x38] sm:$0xff]  ;;  %vm634_vm13 = vcmask 261312   ;;  %vm1244_vm14 = vcmask 326912  }
  0x2e   :  { %v76_v38 = vadd.f32 %v55_v36, %v54_v35  ;;  %v1034_v39 = vsel %vm922_vm1, %v887_v37, 0.0  ;;  %v458_v44 = vld [vmem:[%s3135_s2 + $0x48] sm:$0xff]  ;;  %v457_v45 = vld [vmem:[%s3135_s2 + $0x40] sm:$0xff]  ;;  %v856_v11 = vld [vmem:[%s3136_s3 + $0x30] sm:$0xff]  ;;  %vm1251_vm15 = vcmask 392512   ;;  %vm1272_vm0 = vcmask 589312  }
  0x2f   :  { %68 = vadd.xlane.f32.xlu1 %v67_v50  ;;  %954 = vadd.xlane.f32.xlu0 %v953_v53  ;;  %v508_v46 = vsel %vm3146_vm3, %v458_v44, 0.0  ;;  %v505_v47 = vsel %vm3146_vm3, %v457_v45, 0.0  ;;  %v855_v49 = vld [vmem:[%s3136_s3 + $0x28] sm:$0xff]  ;;  %v965_v50 = vsel %vm922_vm1, %v864_v48, 0.0  ;;  %v872_v53 = vld [vmem:[%s3136_s3 + $0xb0] sm:$0xff]  ;;  %v461_v7 = vld [vmem:[%s3135_s2 + $0x60] sm:$0xff] }
  0x30   :  { %v938_v51 = vsel %vm922_vm1, %v855_v49, 0.0  ;;  %v989_v55 = vsel %vm922_vm1, %v872_v53, 0.0  ;;  %v895_v56 = vld [vmem:[%s3136_s3 + $0x168] sm:$0xff]  ;;  %v873_v15 = vld [vmem:[%s3136_s3 + $0xb8] sm:$0xff]  ;;  %v904_v24 = vld [vmem:[%s3136_s3 + $0x1b0] sm:$0xff] }
  0x31   :  { %v865_v16 = vld [vmem:[%s3136_s3 + $0x78] sm:$0xff]  ;;  %v465_v32 = vld [vmem:[%s3135_s2 + $0x80] sm:$0xff] }
  0x32   :  { %v889_v19 = vld [vmem:[%s3136_s3 + $0x138] sm:$0xff]  ;;  %v529_v36 = vsel %vm3146_vm3, %v465_v32, 0.0  ;;  %v874_v45 = vld [vmem:[%s3136_s3 + $0xc0] sm:$0xff] }
  0x33   :  { %957 = vadd.xlane.f32.xlu1 %v956_v58  ;;  %930 = vadd.xlane.f32.xlu0 %v929_v59  ;;  %v888_v58 = vld [vmem:[%s3136_s3 + $0x130] sm:$0xff]  ;;  %v1058_v59 = vsel %vm922_vm1, %v895_v56, 0.0  ;;  %v881_v20 = vld [vmem:[%s3136_s3 + $0xf8] sm:$0xff]  ;;  %v890_v52 = vld [vmem:[%s3136_s3 + $0x140] sm:$0xff] }
  0x34   :  { %v1037_v61 = vsel %vm922_vm1, %v888_v58, 0.0  ;;  %v1016_v23 = vsel %vm922_vm1, %v881_v20, 0.0  ;;  %v460_v28 = vld [vmem:[%s3135_s2 + $0x58] sm:$0xff]  ;;  %v882_v53 = vld [vmem:[%s3136_s3 + $0x100] sm:$0xff]  ;;  %v467_v20 = vld [vmem:[%s3135_s2 + $0x90] sm:$0xff] }
  0x37   :  { %981 = vadd.xlane.f32.xlu1 %v980_v63  ;;  %978 = vadd.xlane.f32.xlu0 %v977_v0  ;;  %v57_v63 = vld [vmem:[%s3133_s0 + $0x78] sm:$0xff]  ;;  %v896_v0 = vld [vmem:[%s3136_s3 + $0x170] sm:$0xff]  ;;  %s2015_s0 = smov [#allocation4]  }
  0x38   :  { %v79_v1 = vadd.f32 %v57_v63, %v56_v62  ;;  %v1061_v2 = vsel %vm922_vm1, %v896_v0, 0.0  ;;  %v906_v62 = vld [vmem:[%s3136_s3 + $0x1c0] sm:$0xff] }
  0x39   :  { %v898_v63 = vld [vmem:[%s3136_s3 + $0x180] sm:$0xff] }
  0x3b   :  { %933 = vadd.xlane.f32.xlu1 %v932_v5  ;;  %71 = vadd.xlane.f32.xlu0 %v70_v4  ;;  %v452_v4 = vld [vmem:[%s3135_s2 + $0x18] sm:$0xff]  ;;  %v502_v5 = vsel %vm3146_vm3, %v456_v3, 0.0 }
  0x3c   :  { %v490_v6 = vsel %vm3146_vm3, %v452_v4, 0.0  ;;  %v1091_v4 = vsel %vm922_vm1, %v906_v62, 0.0 }
  0x3f   :  { %984 = vadd.xlane.f32.xlu1 %v983_v8  ;;  %960 = vadd.xlane.f32.xlu0 %v959_v9  ;;  %v459_v8 = vld [vmem:[%s3135_s2 + $0x50] sm:$0xff]  ;;  %v517_v9 = vsel %vm3146_vm3, %v461_v7, 0.0  ;;  %v913_v7 = vld [vmem:[%s3136_s3 + $0x1f8] sm:$0xff] }
  0x40   :  { %v511_v10 = vsel %vm3146_vm3, %v459_v8, 0.0 }
  0x43   :  { %1008 = vadd.xlane.f32.xlu1 %v1007_v12  ;;  %1005 = vadd.xlane.f32.xlu0 %v1004_v13  ;;  %v462_v12 = vld [vmem:[%s3135_s2 + $0x68] sm:$0xff]  ;;  %v941_v13 = vsel %vm922_vm1, %v856_v11, 0.0 }
  0x44   :  { %v520_v14 = vsel %vm3146_vm3, %v462_v12, 0.0 }
  0x47   :  { %482 = vadd.xlane.f32.xlu1 %v481_v18  ;;  %74 = vadd.xlane.f32.xlu0 %v73_v17  ;;  %v992_v17 = vsel %vm922_vm1, %v873_v15, 0.0  ;;  %v968_v18 = vsel %vm922_vm1, %v865_v16, 0.0  ;;  %v1112_v16 = vsel %vm922_vm1, %v913_v7, 0.0 }
  0x4b   :  { %494 = vadd.xlane.f32.xlu1 %v493_v21  ;;  %485 = vadd.xlane.f32.xlu0 %v484_v22  ;;  %v82_v21 = vld [vmem:[%s3137_s4] sm:$0xff]  ;;  %v1040_v22 = vsel %vm922_vm1, %v889_v19, 0.0  ;;  %s1806_s4 = sshll.u32 %s2015_s0, 4  ;;  %s1807_s4 = int_to_ptr.vmem [resolvable:$true] %s1806_s4 }
  0x4c   :  { %1863 = vmatpush3.msra.mxu1 %v82_v21  ;;  %v464_v21 = vld [vmem:[%s3135_s2 + $0x78] sm:$0xff]  ;;  %p1968_p1 = scmp.lt.s32.totalorder %s1807_s4, %s1807_s4 }
  0x4d   :  { %1921 = vmatprep.subr.bf16.mxu1 %v2011_v57  ;;  %v526_v32 = vsel %vm3146_vm3, %v464_v21, 0.0 }
  0x4f   :  { %936 = vadd.xlane.f32.xlu1 %v935_v25  ;;  %497 = vadd.xlane.f32.xlu0 %v496_v26  ;;  %v897_v25 = vld [vmem:[%s3136_s3 + $0x178] sm:$0xff]  ;;  %v1085_v26 = vsel %vm922_vm1, %v904_v24, 0.0 }
  0x50   :  { %v1064_v27 = vsel %vm922_vm1, %v897_v25, 0.0 }
  0x53   :  { %987 = vadd.xlane.f32.xlu1 %v986_v29  ;;  %963 = vadd.xlane.f32.xlu0 %v962_v30  ;;  %v905_v29 = vld [vmem:[%s3136_s3 + $0x1b8] sm:$0xff]  ;;  %v514_v30 = vsel %vm3146_vm3, %v460_v28, 0.0 }
  0x54   :  { %v1088_v31 = vsel %vm922_vm1, %v905_v29, 0.0 }
  0x57   :  { %1032 = vadd.xlane.f32.xlu1 %v1031_v33  ;;  %1011 = vadd.xlane.f32.xlu0 %v1010_v34  ;;  %v463_v33 = vld [vmem:[%s3135_s2 + $0x70] sm:$0xff] }
  0x58   :  { %v523_v37 = vsel %vm3146_vm3, %v463_v33, 0.0 }
  0x5b   :  { %77 = vadd.xlane.f32.xlu1 %v76_v38  ;;  %1035 = vadd.xlane.f32.xlu0 %v1034_v39  ;;  %v857_v38 = vld [vmem:[%s3136_s3 + $0x38] sm:$0xff]  ;;  %v466_v39 = vld [vmem:[%s3135_s2 + $0x88] sm:$0xff] }
  0x5c   :  { %v532_v44 = vsel %vm3146_vm3, %v466_v39, 0.0 }
  0x5f   :  { %500 = vadd.xlane.f32.xlu1 %v499_v42  ;;  %488 = vadd.xlane.f32.xlu0 %v487_v43  ;;  %v944_v43 = vsel %vm922_vm1, %v857_v38, 0.0 }
  0x63   :  { %509 = vadd.xlane.f32.xlu1 %v508_v46  ;;  %506 = vadd.xlane.f32.xlu0 %v505_v47  ;;  %v866_v46 = vld [vmem:[%s3136_s3 + $0x80] sm:$0xff]  ;;  %v2429_v47 = vand.u32 127, %v166_v40 }
  0x67   :  { %966 = vadd.xlane.f32.xlu1 %v965_v50  ;;  %939 = vadd.xlane.f32.xlu0 %v938_v51  ;;  %v995_v50 = vsel %vm922_vm1, %v874_v45, 0.0  ;;  %v971_v51 = vsel %vm922_vm1, %v866_v46, 0.0 }
  0x6b   :  { %1014 = vadd.xlane.f32.xlu1 %v1013_v54  ;;  %990 = vadd.xlane.f32.xlu0 %v989_v55  ;;  %v172_v54 = vadd.s32 4294967288, %v2429_v47  ;;  %v2440_v55 = vshrl.u32 %v166_v40, 7 }
  0x6d   :  { %v2451_v0 = vsub.s32 %v172_v54, %v2440_v55 }
  0x6f   :  { %1059 = vadd.xlane.f32.xlu1 %v1058_v59  ;;  %1038 = vadd.xlane.f32.xlu0 %v1037_v61  ;;  %v1043_v59 = vsel %vm922_vm1, %v890_v52, 0.0  ;;  %v1019_v61 = vsel %vm922_vm1, %v882_v53, 0.0  ;;  %v867_v52 = vld [vmem:[%s3136_s3 + $0x88] sm:$0xff]  ;;  %v858_v53 = vld [vmem:[%s3136_s3 + $0x40] sm:$0xff] }
  0x73   :  { %80 = vadd.xlane.f32.xlu1 %v79_v1  ;;  %1062 = vadd.xlane.f32.xlu0 %v1061_v2  ;;  %v2455_v1 = vsub.s32 %v2429_v47, %v2440_v55 }
  0x77   :  { %503 = vadd.xlane.f32.xlu1 %v502_v5  ;;  %491 = vadd.xlane.f32.xlu0 %v490_v6  ;;  %v1067_v5 = vsel %vm922_vm1, %v898_v63, 0.0  ;;  %v914_v6 = vld [vmem:[%s3136_s3 + $0x200] sm:$0xff]  ;;  %v974_v63 = vsel %vm922_vm1, %v867_v52, 0.0 }
  0x7b   :  { %518 = vadd.xlane.f32.xlu1 %v517_v9  ;;  %512 = vadd.xlane.f32.xlu0 %v511_v10  ;;  %v1115_v10 = vsel %vm922_vm1, %v914_v6, 0.0  ;;  %v875_v6 = vld [vmem:[%s3136_s3 + $0xc8] sm:$0xff] }
  0x7f   :  { %942 = vadd.xlane.f32.xlu1 %v941_v13  ;;  %521 = vadd.xlane.f32.xlu0 %v520_v14 }
  0x83   :  { %993 = vadd.xlane.f32.xlu1 %v992_v17  ;;  %969 = vadd.xlane.f32.xlu0 %v968_v18 }
  0x87   :  { %1041 = vadd.xlane.f32.xlu1 %v1040_v22  ;;  %1017 = vadd.xlane.f32.xlu0 %v1016_v23 }
  0x8b   :  { %1086 = vadd.xlane.f32.xlu1 %v1085_v26  ;;  %1065 = vadd.xlane.f32.xlu0 %v1064_v27 }
  0x8f   :  { %515 = vadd.xlane.f32.xlu1 %v514_v30  ;;  %1089 = vadd.xlane.f32.xlu0 %v1088_v31  ;;  %v535_v31 = vsel %vm3146_vm3, %v467_v20, 0.0 }
  0x90   :  { %v2409_v34 = vpop.xlane.xlu1 %107  ;;  %v2411_v35 = vpop.xlane.xlu0 %101 }
  0x91   :  { %v182_v11 = vrot.slane %v2409_v34, %v2455_v1  ;;  %v171_v17 = vrot.slane %v2411_v35, %v2455_v1 }
  0x93   :  { %530 = vadd.xlane.f32.xlu1 %v529_v36  ;;  %524 = vadd.xlane.f32.xlu0 %v523_v37  ;;  %v470_v36 = vld [vmem:[%s3135_s2 + $0xa8] sm:$0xff]  ;;  %v469_v37 = vld [vmem:[%s3135_s2 + $0xa0] sm:$0xff] }
  0x94   :  { %v111_v41 = vpop.xlane.xlu1 %110  ;;  %v105_v42 = vpop.xlane.xlu0 %104  ;;  %v544_v46 = vsel %vm3146_vm3, %v470_v36, 0.0 }
  0x95   :  { %v186_v8 = vrot.slane %v111_v41, %v2451_v0  ;;  %v176_v9 = vrot.slane %v105_v42, %v2451_v0 }
  0x97   :  { %945 = vadd.xlane.f32.xlu1 %v944_v43  ;;  %533 = vadd.xlane.f32.xlu0 %v532_v44  ;;  %v187_v22 = vsel %vm177_vm4, %v186_v8, %v182_v11  ;;  %v178_v25 = vsel %vm177_vm4, %v176_v9, %v171_v17  ;;  %v998_v11 = vsel %vm922_vm1, %v875_v6, 0.0  ;;  %v900_v6 = vld [vmem:[%s3136_s3 + $0x190] sm:$0xff] }
  0x98   :  { %v117_v48 = vpop.xlane.xlu1 %116  ;;  %v114_v49 = vpop.xlane.xlu0 %113  ;;  %v243_v38 = vsel %vm242_vm5, %v187_v22, %v178_v25  ;;  %v915_v22 = vld [vmem:[%s3136_s3 + $0x208] sm:$0xff] }
  0x99   :  { %v195_v12 = vrot.slane %v117_v48, %v2451_v0  ;;  %v191_v13 = vrot.slane %v114_v49, %v2455_v1  ;;  %v541_v48 = vsel %vm3146_vm3, %v469_v37, 0.0 }
  0x9b   :  { %996 = vadd.xlane.f32.xlu1 %v995_v50  ;;  %972 = vadd.xlane.f32.xlu0 %v971_v51  ;;  %v196_v28 = vsel %vm177_vm4, %v195_v12, %v191_v13  ;;  %v899_v13 = vld [vmem:[%s3136_s3 + $0x188] sm:$0xff] }
  0x9c   :  { %v123_v56 = vpop.xlane.xlu1 %122  ;;  %v120_v58 = vpop.xlane.xlu0 %119  ;;  %v245_v40 = vsel %vm244_vm6, %v196_v28, %v243_v38  ;;  %v1118_v28 = vsel %vm922_vm1, %v915_v22, 0.0  ;;  %v472_v22 = vld [vmem:[%s3135_s2 + $0xb8] sm:$0xff] }
  0x9d   :  { %v204_v18 = vrot.slane %v123_v56, %v2451_v0  ;;  %v200_v19 = vrot.slane %v120_v58, %v2455_v1 }
  0x9f   :  { %1044 = vadd.xlane.f32.xlu1 %v1043_v59  ;;  %1020 = vadd.xlane.f32.xlu0 %v1019_v61  ;;  %v205_v33 = vsel %vm177_vm4, %v204_v18, %v200_v19  ;;  %v1070_v18 = vsel %vm922_vm1, %v899_v13, 0.0  ;;  %v916_v13 = vld [vmem:[%s3136_s3 + $0x210] sm:$0xff] }
  0xa0   :  { %v129_v2 = vpop.xlane.xlu1 %128  ;;  %v126_v3 = vpop.xlane.xlu0 %125  ;;  %v247_v42 = vsel %vm246_vm7, %v205_v33, %v245_v40 }
  0xa1   :  { %v213_v23 = vrot.slane %v129_v2, %v2451_v0  ;;  %v209_v24 = vrot.slane %v126_v3, %v2455_v1  ;;  %v947_v2 = vsel %vm922_vm1, %v858_v53, 0.0 }
  0xa3   :  { %1092 = vadd.xlane.f32.xlu1 %v1091_v4  ;;  %1068 = vadd.xlane.f32.xlu0 %v1067_v5  ;;  %v214_v39 = vsel %vm177_vm4, %v213_v23, %v209_v24  ;;  %v883_v5 = vld [vmem:[%s3136_s3 + $0x108] sm:$0xff]  ;;  %v622_v24 = vadd.s32 4294967280, %v2429_v47 }
  0xa4   :  { %v135_v14 = vpop.xlane.xlu1 %134  ;;  %v132_v15 = vpop.xlane.xlu0 %131  ;;  %v249_v49 = vsel %vm248_vm8, %v214_v39, %v247_v42  ;;  %v907_v23 = vld [vmem:[%s3136_s3 + $0x1c8] sm:$0xff] }
  0xa5   :  { %v222_v26 = vrot.slane %v135_v14, %v2451_v0  ;;  %v218_v27 = vrot.slane %v132_v15, %v2455_v1  ;;  %v891_v14 = vld [vmem:[%s3136_s3 + $0x148] sm:$0xff]  ;;  %v2564_v33 = vsub.s32 %v622_v24, %v2440_v55 }
  0xa6   :  { %v1046_v19 = vsel %vm922_vm1, %v891_v14, 0.0  ;;  %v908_v14 = vld [vmem:[%s3136_s3 + $0x1d0] sm:$0xff] }
  0xa7   :  { %1116 = vadd.xlane.f32.xlu1 %v1115_v10  ;;  %1113 = vadd.xlane.f32.xlu0 %v1112_v16  ;;  %v223_v41 = vsel %vm177_vm4, %v222_v26, %v218_v27  ;;  %v1022_v10 = vsel %vm922_vm1, %v883_v5, 0.0 }
  0xa8   :  { %v141_v29 = vpop.xlane.xlu1 %140  ;;  %v138_v30 = vpop.xlane.xlu0 %137  ;;  %v251_v54 = vsel %vm250_vm9, %v223_v41, %v249_v49 }
  0xa9   :  { %v231_v34 = vrot.slane %v141_v29, %v2451_v0  ;;  %v227_v35 = vrot.slane %v138_v30, %v2455_v1  ;;  %v1094_v29 = vsel %vm922_vm1, %v907_v23, 0.0 }
  0xab   :  { %536 = vadd.xlane.f32.xlu1 %v535_v31  ;;  %527 = vadd.xlane.f32.xlu0 %v526_v32  ;;  %v232_v43 = vsel %vm177_vm4, %v231_v34, %v227_v35  ;;  %v471_v34 = vld [vmem:[%s3135_s2 + $0xb0] sm:$0xff]  ;;  %v468_v35 = vld [vmem:[%s3135_s2 + $0x98] sm:$0xff] }
  0xac   :  { %v147_v44 = vpop.xlane.xlu1 %146  ;;  %v144_v45 = vpop.xlane.xlu0 %143  ;;  %v253_v58 = vsel %vm252_vm10, %v232_v43, %v251_v54  ;;  %v547_v40 = vsel %vm3146_vm3, %v471_v34, 0.0  ;;  %v538_v41 = vsel %vm3146_vm3, %v468_v35, 0.0 }
  0xad   :  { %v240_v50 = vrot.slane %v147_v44, %v2451_v0  ;;  %v236_v51 = vrot.slane %v144_v45, %v2455_v1  ;;  %v474_v44 = vld [vmem:[%s3135_s2 + $0xc8] sm:$0xff]  ;;  %v473_v45 = vld [vmem:[%s3135_s2 + $0xc0] sm:$0xff] }
  0xae   :  { %v556_v52 = vsel %vm3146_vm3, %v474_v44, 0.0  ;;  %v553_v53 = vsel %vm3146_vm3, %v473_v45, 0.0 }
  0xaf   :  { %545 = vadd.xlane.f32.xlu1 %v544_v46  ;;  %542 = vadd.xlane.f32.xlu0 %v541_v48  ;;  %v241_v56 = vsel %vm177_vm4, %v240_v50, %v236_v51  ;;  %v629_v46 = vadd.s32 4294967272, %v2429_v47 }
  0xb0   :  { %v63_v59 = vpop.xlane.xlu1 %62  ;;  %v60_v61 = vpop.xlane.xlu0 %59  ;;  %v255_v62 = vsel %vm254_vm11, %v241_v56, %v253_v58 }
  0xb1   :  { %v344_v3 = vrot.slane %v63_v59, %v2455_v1  ;;  %v340_v4 = vrot.slane %v60_v61, %v2455_v1  ;;  %1860 = vmatmul.mubr.msk.f32.vlgmr.msra.gmra.mrb[0].mxu0 %vm3146_vm3, %v255_v62  ;;  %v2596_v58 = vsub.s32 %v629_v46, %v2440_v55  ;;  %v884_v59 = vld [vmem:[%s3136_s3 + $0x110] sm:$0xff] }
  0xb2   :  { %1896 = vmatprep.mubr.msk.f32.mxu0 %vm2012_vm2, %v2013_v60  ;;  %v876_v61 = vld [vmem:[%s3136_s3 + $0xd0] sm:$0xff] }
  0xb3   :  { %v369_v7 = vsel %vm242_vm5, %v344_v3, %v340_v4  ;;  %975 = vadd.xlane.f32.xlu1 %v974_v63  ;;  %948 = vadd.xlane.f32.xlu0 %v947_v2  ;;  %v1025_v3 = vsel %vm922_vm1, %v884_v59, 0.0  ;;  %v1001_v4 = vsel %vm922_vm1, %v876_v61, 0.0 }
  0xb4   :  { %v925_v8 = vpop.xlane.xlu1 %924  ;;  %v66_v9 = vpop.xlane.xlu0 %65 }
  0xb5   :  { %v348_v12 = vrot.slane %v66_v9, %v2455_v1  ;;  %v1223_v20 = vrot.slane %v925_v8, %v2455_v1 }
  0xb7   :  { %v370_v15 = vsel %vm244_vm6, %v348_v12, %v369_v7  ;;  %1023 = vadd.xlane.f32.xlu1 %v1022_v10  ;;  %999 = vadd.xlane.f32.xlu0 %v998_v11  ;;  %v892_v7 = vld [vmem:[%s3136_s3 + $0x150] sm:$0xff]  ;;  %v1073_v11 = vsel %vm922_vm1, %v900_v6, 0.0 }
  0xb8   :  { %v952_v16 = vpop.xlane.xlu1 %951  ;;  %v928_v17 = vpop.xlane.xlu0 %927  ;;  %v1049_v12 = vsel %vm922_vm1, %v892_v7, 0.0 }
  0xb9   :  { %v1227_v21 = vrot.slane %v928_v17, %v2451_v0  ;;  %v1277_v30 = vrot.slane %v952_v16, %v2455_v1  ;;  %v1121_v17 = vsel %vm922_vm1, %v916_v13, 0.0 }
  0xbb   :  { %v1228_v25 = vsel %vm177_vm4, %v1227_v21, %v1223_v20  ;;  %1071 = vadd.xlane.f32.xlu1 %v1070_v18  ;;  %1047 = vadd.xlane.f32.xlu0 %v1046_v19  ;;  %v1097_v18 = vsel %vm922_vm1, %v908_v14, 0.0  ;;  %v475_v21 = vld [vmem:[%s3135_s2 + $0xd0] sm:$0xff] }
  0xbc   :  { %v69_v26 = vpop.xlane.xlu1 %68  ;;  %v955_v27 = vpop.xlane.xlu0 %954 }
  0xbd   :  { %v352_v31 = vrot.slane %v69_v26, %v2455_v1  ;;  %v1281_v32 = vrot.slane %v955_v27, %v2451_v0  ;;  %v559_v26 = vsel %vm3146_vm3, %v475_v21, 0.0  ;;  %v550_v27 = vsel %vm3146_vm3, %v472_v22, 0.0 }
  0xbf   :  { %v2573_v36 = vsel %vm246_vm7, %v352_v31, %v370_v15  ;;  %v1282_v37 = vsel %vm177_vm4, %v1281_v32, %v1277_v30  ;;  %1119 = vadd.xlane.f32.xlu1 %v1118_v28  ;;  %1095 = vadd.xlane.f32.xlu0 %v1094_v29  ;;  %v478_v28 = vld [vmem:[%s3135_s2 + $0xe8] sm:$0xff]  ;;  %v477_v29 = vld [vmem:[%s3135_s2 + $0xe0] sm:$0xff]  ;;  %v1239_v30 = vadd.s32 4294967264, %v2429_v47 }
  0xc0   :  { %v958_v38 = vpop.xlane.xlu1 %957  ;;  %v931_v39 = vpop.xlane.xlu0 %930  ;;  %v568_v34 = vsel %vm3146_vm3, %v478_v28, 0.0  ;;  %v565_v35 = vsel %vm3146_vm3, %v477_v29, 0.0  ;;  %v910_v28 = vld [vmem:[%s3136_s3 + $0x1e0] sm:$0xff] }
  0xc1   :  { %v1286_v42 = vrot.slane %v958_v38, %v2564_v33  ;;  %v1232_v43 = vrot.slane %v931_v39, %v2564_v33  ;;  %v2658_v39 = vsub.s32 %v1239_v30, %v2440_v55 }
  0xc3   :  { %v2588_v48 = vsel %vm627_vm12, %v1286_v42, %v1282_v37  ;;  %v1233_v49 = vsel %vm627_vm12, %v1232_v43, %v1228_v25  ;;  %548 = vadd.xlane.f32.xlu1 %v547_v40  ;;  %539 = vadd.xlane.f32.xlu0 %v538_v41  ;;  %v893_v40 = vld [vmem:[%s3136_s3 + $0x158] sm:$0xff] }
  0xc4   :  { %v982_v50 = vpop.xlane.xlu1 %981  ;;  %v979_v51 = vpop.xlane.xlu0 %978  ;;  %v885_v41 = vld [vmem:[%s3136_s3 + $0x118] sm:$0xff]  ;;  %v1052_v45 = vsel %vm922_vm1, %v893_v40, 0.0  ;;  %v918_v40 = vld [vmem:[%s3136_s3 + $0x220] sm:$0xff] }
  0xc5   :  { %v1325_v54 = vrot.slane %v982_v50, %v2451_v0  ;;  %v1321_v56 = vrot.slane %v979_v51, %v2455_v1  ;;  %v1028_v46 = vsel %vm922_vm1, %v885_v41, 0.0  ;;  %v1246_v41 = vadd.s32 4294967256, %v2429_v47 }
  0xc7   :  { %v2605_v62 = vsel %vm177_vm4, %v1325_v54, %v1321_v56  ;;  %557 = vadd.xlane.f32.xlu1 %v556_v52  ;;  %554 = vadd.xlane.f32.xlu0 %v553_v53  ;;  %v909_v52 = vld [vmem:[%s3136_s3 + $0x1d8] sm:$0xff] }
  0xc8   :  { %v934_v63 = vpop.xlane.xlu1 %933  ;;  %v2607_v2 = vpop.xlane.xlu0 %71  ;;  %v901_v53 = vld [vmem:[%s3136_s3 + $0x198] sm:$0xff] }
  0xc9   :  { %v1237_v5 = vrot.slane %v934_v63, %v2596_v58 }
  0xcb   :  { %v1238_v8 = vsel %vm634_vm13, %v1237_v5, %v1233_v49  ;;  %1026 = vadd.xlane.f32.xlu1 %v1025_v3  ;;  %1002 = vadd.xlane.f32.xlu0 %v1001_v4  ;;  %v1100_v4 = vsel %vm922_vm1, %v909_v52, 0.0  ;;  %v1076_v5 = vsel %vm922_vm1, %v901_v53, 0.0  ;;  %v2754_v53 = vsub.s32 %v1246_v41, %v2440_v55 }
  0xcc   :  { %v2619_v9 = vpop.xlane.xlu1 %984  ;;  %v2621_v10 = vpop.xlane.xlu0 %960 }
  0xcd   :  { %v1330_v54 = vrot.slane %v2619_v9, %v2564_v33  ;;  %v1291_v56 = vrot.slane %v2621_v10, %v2596_v58  ;;  %v476_v9 = vld [vmem:[%s3135_s2 + $0xd8] sm:$0xff] }
  0xcf   :  { %1074 = vadd.xlane.f32.xlu1 %v1073_v11  ;;  %1050 = vadd.xlane.f32.xlu0 %v1049_v12  ;;  %v1331_v10 = vsel %vm627_vm12, %v1330_v54, %v2605_v62  ;;  %v1292_v11 = vsel %vm634_vm13, %v1291_v56, %v2588_v48  ;;  %v894_v62 = vld [vmem:[%s3136_s3 + $0x160] sm:$0xff]  ;;  %v479_v48 = vld [vmem:[%s3135_s2 + $0xf0] sm:$0xff]  ;;  %v903_v54 = vld [vmem:[%s3136_s3 + $0x1a8] sm:$0xff] }
  0xd0   :  { %v1009_v15 = vpop.xlane.xlu1 %1008  ;;  %v1006_v16 = vpop.xlane.xlu0 %1005  ;;  %v1055_v22 = vsel %vm922_vm1, %v894_v62, 0.0  ;;  %v356_v62 = vrot.slane %v2607_v2, %v2455_v1 }
  0xd1   :  { %v1369_v19 = vrot.slane %v1009_v15, %v2451_v0  ;;  %v1365_v20 = vrot.slane %v1006_v16, %v2455_v1  ;;  %v562_v16 = vsel %vm3146_vm3, %v476_v9, 0.0  ;;  %v919_v9 = vld [vmem:[%s3136_s3 + $0x228] sm:$0xff] }
  0xd3   :  { %v1370_v23 = vsel %vm177_vm4, %v1369_v19, %v1365_v20  ;;  %1122 = vadd.xlane.f32.xlu1 %v1121_v17  ;;  %1098 = vadd.xlane.f32.xlu0 %v1097_v18 }
  0xd4   :  { %v483_v24 = vpop.xlane.xlu1 %482  ;;  %v2642_v25 = vpop.xlane.xlu0 %74 }
  0xd5   :  { %v616_v37 = vrot.slane %v483_v24, %v2455_v1  ;;  %v571_v24 = vsel %vm3146_vm3, %v479_v48, 0.0 }
  0xd7   :  { %560 = vadd.xlane.f32.xlu1 %v559_v26  ;;  %551 = vadd.xlane.f32.xlu0 %v550_v27 }
  0xd8   :  { %v495_v31 = vpop.xlane.xlu1 %494  ;;  %v486_v32 = vpop.xlane.xlu0 %485 }
  0xd9   :  { %v620_v38 = vrot.slane %v486_v32, %v2451_v0  ;;  %v639_v49 = vrot.slane %v495_v31, %v2455_v1  ;;  %v1103_v32 = vsel %vm922_vm1, %v910_v28, 0.0 }
  0xdb   :  { %v2667_v42 = vsel %vm177_vm4, %v620_v38, %v616_v37  ;;  %569 = vadd.xlane.f32.xlu1 %v568_v34  ;;  %566 = vadd.xlane.f32.xlu0 %v565_v35  ;;  %v480_v38 = vld [vmem:[%s3135_s2 + $0xf8] sm:$0xff] }
  0xdc   :  { %v937_v43 = vpop.xlane.xlu1 %936  ;;  %v498_v44 = vpop.xlane.xlu0 %497 }
  0xdd   :  { %v1243_v50 = vrot.slane %v937_v43, %v2658_v39  ;;  %v643_v51 = vrot.slane %v498_v44, %v2451_v0 }
  0xdf   :  { %v2685_v59 = vsel %vm1244_vm14, %v1243_v50, %v1238_v8  ;;  %v644_v61 = vsel %vm177_vm4, %v643_v51, %v639_v49  ;;  %1053 = vadd.xlane.f32.xlu1 %v1052_v45  ;;  %1029 = vadd.xlane.f32.xlu0 %v1028_v46  ;;  %v917_v8 = vld [vmem:[%s3136_s3 + $0x218] sm:$0xff]  ;;  %v574_v49 = vsel %vm3146_vm3, %v480_v38, 0.0  ;;  %v1127_v50 = vsel %vm922_vm1, %v918_v40, 0.0 }
  0xe0   :  { %v988_v63 = vpop.xlane.xlu1 %987  ;;  %v964_v3 = vpop.xlane.xlu0 %963  ;;  %v1124_v17 = vsel %vm922_vm1, %v917_v8, 0.0  ;;  %vm1265_vm3 = vcmask 523712  }
  0xe1   :  { %v1335_v6 = vrot.slane %v988_v63, %v2596_v58  ;;  %v1296_v7 = vrot.slane %v964_v3, %v2658_v39 }
  0xe3   :  { %v2703_v12 = vsel %vm634_vm13, %v1335_v6, %v1331_v10  ;;  %v1297_v13 = vsel %vm1244_vm14, %v1296_v7, %v1292_v11  ;;  %1101 = vadd.xlane.f32.xlu1 %v1100_v4  ;;  %1077 = vadd.xlane.f32.xlu0 %v1076_v5  ;;  %v1082_v4 = vsel %vm922_vm1, %v903_v54, 0.0  ;;  %v912_v7 = vld [vmem:[%s3136_s3 + $0x1f0] sm:$0xff] }
  0xe4   :  { %v1033_v14 = vpop.xlane.xlu1 %1032  ;;  %v1012_v15 = vpop.xlane.xlu0 %1011 }
  0xe5   :  { %v1374_v18 = vrot.slane %v1012_v15, %v2564_v33  ;;  %v1409_v26 = vrot.slane %v1033_v14, %v2455_v1  ;;  %v1109_v15 = vsel %vm922_vm1, %v912_v7, 0.0 }
  0xe7   :  { %v1375_v19 = vsel %vm627_vm12, %v1374_v18, %v1370_v23  ;;  %563 = vadd.xlane.f32.xlu1 %v562_v16  ;;  %1125 = vadd.xlane.f32.xlu0 %v1124_v17  ;;  %v902_v23 = vld [vmem:[%s3136_s3 + $0x1a0] sm:$0xff]  ;;  %v1130_v16 = vsel %vm922_vm1, %v919_v9, 0.0 }
  0xe8   :  { %v2716_v20 = vpop.xlane.xlu1 %77  ;;  %v1036_v21 = vpop.xlane.xlu0 %1035  ;;  %v1079_v34 = vsel %vm922_vm1, %v902_v23, 0.0  ;;  %v578_v23 = vld [vmem:[%s3139_s6 + $0x8] sm:$0xff]  ;;  %v1143_v9 = vld [vmem:[%s3140_s7 + $0x20] sm:$0xff] }
  0xe9   :  { %v1413_v27 = vrot.slane %v1036_v21, %v2451_v0 }
  0xeb   :  { %v2729_v29 = vsel %vm177_vm4, %v1413_v27, %v1409_v26  ;;  %1056 = vadd.xlane.f32.xlu1 %v1055_v22  ;;  %572 = vadd.xlane.f32.xlu0 %v571_v24  ;;  %v360_v22 = vrot.slane %v2642_v25, %v2455_v1  ;;  %v1139_v25 = vld [vmem:[%s3140_s7] sm:$0xff] }
  0xec   :  { %v501_v30 = vpop.xlane.xlu1 %500  ;;  %v489_v31 = vpop.xlane.xlu0 %488 }
  0xed   :  { %v648_v35 = vrot.slane %v501_v30, %v2564_v33  ;;  %v626_v37 = vrot.slane %v489_v31, %v2564_v33  ;;  %v1140_v30 = vld [vmem:[%s3140_s7 + $0x8] sm:$0xff]  ;;  %v372_v31 = vsel %vm248_vm8, %v356_v62, %v2573_v36 }
  0xef   :  { %v2743_v43 = vsel %vm627_vm12, %v648_v35, %v644_v61  ;;  %v2747_v44 = vsel %vm627_vm12, %v626_v37, %v2667_v42  ;;  %1104 = vadd.xlane.f32.xlu1 %v1103_v32  ;;  %1080 = vadd.xlane.f32.xlu0 %v1079_v34  ;;  %v911_v42 = vld [vmem:[%s3136_s3 + $0x1e8] sm:$0xff]  ;;  %v373_v34 = vsel %vm250_vm9, %v360_v22, %v372_v31 }
  0xf0   :  { %v510_v45 = vpop.xlane.xlu1 %509  ;;  %v507_v46 = vpop.xlane.xlu0 %506  ;;  %v1106_v3 = vsel %vm922_vm1, %v911_v42, 0.0 }
  0xf1   :  { %v662_v51 = vrot.slane %v510_v45, %v2451_v0  ;;  %v658_v52 = vrot.slane %v507_v46, %v2455_v1  ;;  %v580_v46 = vld [vmem:[%s3139_s6 + $0x18] sm:$0xff] }
  0xf3   :  { %v2763_v56 = vsel %vm177_vm4, %v662_v51, %v658_v52  ;;  %575 = vadd.xlane.f32.xlu1 %v574_v49  ;;  %1128 = vadd.xlane.f32.xlu0 %v1127_v50  ;;  %v1141_v51 = vld [vmem:[%s3140_s7 + $0x10] sm:$0xff]  ;;  %v1142_v52 = vld [vmem:[%s3140_s7 + $0x18] sm:$0xff] }
  0xf4   :  { %v967_v61 = vpop.xlane.xlu1 %966  ;;  %v940_v63 = vpop.xlane.xlu0 %939 }
  0xf5   :  { %v1301_v5 = vrot.slane %v967_v61, %v2754_v53  ;;  %v1250_v6 = vrot.slane %v940_v63, %v2754_v53  ;;  %v1931_v61 = vpack.c.bf16 %v1142_v52, %v1141_v51 }
  0xf7   :  { %v2776_v8 = vsel %vm1251_vm15, %v1301_v5, %v1297_v13  ;;  %v2780_v10 = vsel %vm1251_vm15, %v1250_v6, %v2685_v59  ;;  %1107 = vadd.xlane.f32.xlu1 %v1106_v3  ;;  %1083 = vadd.xlane.f32.xlu0 %v1082_v4  ;;  %v920_v13 = vld [vmem:[%s3136_s3 + $0x230] sm:$0xff]  ;;  %v921_v59 = vld [vmem:[%s3136_s3 + $0x238] sm:$0xff]  ;;  %v1253_v4 = vadd.s32 4294967248, %v2429_v47 }
  0xf8   :  { %v1015_v11 = vpop.xlane.xlu1 %1014  ;;  %v991_v14 = vpop.xlane.xlu0 %990  ;;  %v1133_v27 = vsel %vm922_vm1, %v920_v13, 0.0  ;;  %v1136_v28 = vsel %vm922_vm1, %v921_v59, 0.0  ;;  %vm376_vm1 = vcmask 64512   ;;  %v1145_v13 = vld [vmem:[%s3140_s7 + $0x30] sm:$0xff]  ;;  %v1146_v59 = vld [vmem:[%s3140_s7 + $0x38] sm:$0xff] }
  0xf9   :  { %v1379_v17 = vrot.slane %v1015_v11, %v2596_v58  ;;  %v1340_v18 = vrot.slane %v991_v14, %v2658_v39  ;;  %v1144_v11 = vld [vmem:[%s3140_s7 + $0x28] sm:$0xff] }
  0xfb   :  { %v2795_v48 = vsel %vm634_vm13, %v1379_v17, %v1375_v19  ;;  %v2799_v21 = vsel %vm1244_vm14, %v1340_v18, %v2703_v12  ;;  %1110 = vadd.xlane.f32.xlu1 %v1109_v15  ;;  %1131 = vadd.xlane.f32.xlu0 %v1130_v16  ;;  %v577_v19 = vld [vmem:[%s3139_s6] sm:$0xff]  ;;  %v364_v12 = vrot.slane %v2716_v20, %v2455_v1 }
  0xfc   :  { %v1060_v24 = vpop.xlane.xlu1 %1059  ;;  %v1039_v26 = vpop.xlane.xlu0 %1038  ;;  %v1928_v20 = vpack.c.bf16 %v1140_v30, %v1139_v25  ;;  %v1922_v45 = vpack.c.bf16 %v578_v23, %v577_v19  ;;  %v1934_v17 = vpack.c.bf16 %v1144_v11, %v1143_v9  ;;  %v2868_v18 = vsub.s32 %v1253_v4, %v2440_v55  ;;  %v1147_v30 = vld [vmem:[%s3140_s7 + $0x40] sm:$0xff] }
  0xfd   :  { %v1418_v2 = vrot.slane %v1039_v26, %v2564_v33  ;;  %v1453_v38 = vrot.slane %v1060_v24, %v2455_v1  ;;  %v374_v36 = vsel %vm252_vm10, %v364_v12, %v373_v34  ;;  %v1937_v24 = vpack.c.bf16 %v1146_v59, %v1145_v13 }
  0xfe   :  { %1929 = vmatpush3.bf16.msra.mxu0 %v1928_v20 }
  0xff   :  { %v2824_v32 = vsel %vm627_vm12, %v1418_v2, %v2729_v29  ;;  %1134 = vadd.xlane.f32.xlu0 %v1133_v27  ;;  %1137 = vadd.xlane.f32.xlu1 %v1136_v28  ;;  %v579_v29 = vld [vmem:[%s3139_s6 + $0x10] sm:$0xff] }
 0x100   :  { %v81_v35 = vpop.xlane.xlu1 %80  ;;  %v1063_v37 = vpop.xlane.xlu0 %1062  ;;  %1930 = vmatprep.subr.bf16.mxu0 %v2011_v57  ;;  %v1925_v5 = vpack.c.bf16 %v580_v46, %v579_v29 }
 0x101   :  { %v368_v40 = vrot.slane %v81_v35, %v2455_v1  ;;  %v1457_v41 = vrot.slane %v1063_v37, %v2451_v0 }
 0x102   :  { %1932 = vmatpush3.bf16.msra.mxu0 %v1931_v61 }
 0x103   :  { %v2839_v49 = vsel %vm177_vm4, %v1457_v41, %v1453_v38  ;;  %v375_v50 = vsel %vm254_vm11, %v368_v40, %v374_v36  ;;  %1933 = vmatprep.subr.bf16.mxu0 %v2011_v57 }
 0x104   :  { %v504_v42 = vpop.xlane.xlu1 %503  ;;  %1865 = vmatmul.mubr.msk.f32.vlgmr.msra.gmra.mrb[0].mxu1 %vm376_vm1, %v375_v50  ;;  %v492_v54 = vpop.xlane.xlu0 %491  ;;  %vm1258_vm1 = vcmask 458112  }
 0x105   :  { %v653_v63 = vrot.slane %v504_v42, %v2596_v58  ;;  %v633_v3 = vrot.slane %v492_v54, %v2596_v58  ;;  %1923 = vmatpush3.bf16.msra.mxu1 %v1922_v45  ;;  %1875 = vmatprep.mubr.msk.f32.mxu1 %vm2012_vm2, %v2013_v60 }
 0x106   :  { %1924 = vmatprep.subr.bf16.mxu1 %v2011_v57  ;;  %1935 = vmatpush3.bf16.msra.mxu0 %v1934_v17 }
 0x107   :  { %v654_v6 = vsel %vm634_vm13, %v653_v63, %v2743_v43  ;;  %v635_v7 = vsel %vm634_vm13, %v633_v3, %v2747_v44  ;;  %1936 = vmatprep.subr.bf16.mxu0 %v2011_v57 }
 0x108   :  { %v769_v14 = vsel %vm242_vm5, %v654_v6, %v635_v7  ;;  %v519_v15 = vpop.xlane.xlu1 %518  ;;  %v513_v16 = vpop.xlane.xlu0 %512 }
 0x109   :  { %v667_v43 = vrot.slane %v513_v16, %v2564_v33  ;;  %1926 = vmatpush3.bf16.msra.mxu1 %v1925_v5  ;;  %v677_v26 = vrot.slane %v519_v15, %v2455_v1 }
 0x10a   :  { %1939 = vmatprep.subr.bf16.mxu1 %v2011_v57  ;;  %1938 = vmatpush3.bf16.msra.mxu0 %v1937_v24 }
 0x10b   :  { %v668_v44 = vsel %vm627_vm12, %v667_v43, %v2763_v56  ;;  %1894 = vmatprep.subr.mxu0 %v2013_v60 }
 0x10c   :  { %v943_v62 = vpop.xlane.xlu1 %942  ;;  %v522_v22 = vpop.xlane.xlu0 %521 }
 0x10d   :  { %v1257_v27 = vrot.slane %v943_v62, %v2868_v18  ;;  %v681_v56 = vrot.slane %v522_v22, %v2451_v0 }
 0x10e   :  { %1895 = vmatpush3.msra.mxu0 %v1147_v30 }
 0x10f   :  { %v1259_v28 = vsel %vm1258_vm1, %v1257_v27, %v2780_v10  ;;  %v682_v2 = vsel %vm177_vm4, %v681_v56, %v677_v26 }
 0x110   :  { %v994_v19 = vpop.xlane.xlu1 %993  ;;  %v970_v12 = vpop.xlane.xlu0 %969 }
 0x111   :  { %v1345_v23 = vrot.slane %v994_v19, %v2754_v53  ;;  %v1306_v25 = vrot.slane %v970_v12, %v2868_v18 }
 0x113   :  { %v1346_v31 = vsel %vm1251_vm15, %v1345_v23, %v2799_v21  ;;  %v1307_v10 = vsel %vm1258_vm1, %v1306_v25, %v2776_v8 }
 0x114   :  { %v1042_v20 = vpop.xlane.xlu1 %1041  ;;  %v1018_v34 = vpop.xlane.xlu0 %1017 }
 0x115   :  { %v1423_v35 = vrot.slane %v1042_v20, %v2596_v58  ;;  %v1384_v37 = vrot.slane %v1018_v34, %v2658_v39 }
 0x117   :  { %v1424_v38 = vsel %vm634_vm13, %v1423_v35, %v2824_v32  ;;  %v1385_v40 = vsel %vm1244_vm14, %v1384_v37, %v2795_v48  ;;  %v1260_v32 = vadd.s32 4294967240, %v2429_v47 }
 0x118   :  { %v1087_v41 = vpop.xlane.xlu1 %1086  ;;  %v1066_v45 = vpop.xlane.xlu0 %1065 }
 0x119   :  { %v1462_v36 = vrot.slane %v1066_v45, %v2564_v33  ;;  %v1497_v46 = vrot.slane %v1087_v41, %v2455_v1  ;;  %v2914_v63 = vsub.s32 %v1260_v32, %v2440_v55 }
 0x11b   :  { %v1463_v21 = vsel %vm627_vm12, %v1462_v36, %v2839_v49 }
 0x11c   :  { %v516_v8 = vpop.xlane.xlu1 %515  ;;  %v1090_v29 = vpop.xlane.xlu0 %1089 }
 0x11d   :  { %v672_v50 = vrot.slane %v516_v8, %v2596_v58  ;;  %v1501_v51 = vrot.slane %v1090_v29, %v2451_v0 }
 0x11f   :  { %v673_v52 = vsel %vm634_vm13, %v672_v50, %v668_v44  ;;  %v1502_v48 = vsel %vm177_vm4, %v1501_v51, %v1497_v46 }
 0x120   :  { %v770_v42 = vsel %vm244_vm6, %v673_v52, %v769_v14  ;;  %v531_v54 = vpop.xlane.xlu1 %530  ;;  %v525_v61 = vpop.xlane.xlu0 %524 }
 0x121   :  { %v686_v49 = vrot.slane %v525_v61, %v2564_v33  ;;  %v696_v6 = vrot.slane %v531_v54, %v2455_v1 }
 0x123   :  { %v687_v3 = vsel %vm627_vm12, %v686_v49, %v682_v2 }
 0x124   :  { %v946_v4 = vpop.xlane.xlu1 %945  ;;  %v534_v5 = vpop.xlane.xlu0 %533 }
 0x125   :  { %v1264_v7 = vrot.slane %v946_v4, %v2914_v63  ;;  %v700_v9 = vrot.slane %v534_v5, %v2451_v0 }
 0x127   :  { %v1266_v11 = vsel %vm1265_vm3, %v1264_v7, %v1259_v28  ;;  %v701_v14 = vsel %vm177_vm4, %v700_v9, %v696_v6 }
 0x128   :  { %v997_v15 = vpop.xlane.xlu1 %996  ;;  %v973_v16 = vpop.xlane.xlu0 %972 }
 0x129   :  { %v1350_v17 = vrot.slane %v997_v15, %v2868_v18  ;;  %v1311_v43 = vrot.slane %v973_v16, %v2914_v63 }
 0x12b   :  { %v1351_v44 = vsel %vm1258_vm1, %v1350_v17, %v1346_v31  ;;  %v1312_v13 = vsel %vm1265_vm3, %v1311_v43, %v1307_v10 }
 0x12c   :  { %v1045_v59 = vpop.xlane.xlu1 %1044  ;;  %v1021_v62 = vpop.xlane.xlu0 %1020 }
 0x12d   :  { %v1428_v22 = vrot.slane %v1045_v59, %v2658_v39  ;;  %v1389_v24 = vrot.slane %v1021_v62, %v2754_v53 }
 0x12f   :  { %v2929_v26 = vsel %vm1244_vm14, %v1428_v22, %v1424_v38  ;;  %v1390_v27 = vsel %vm1251_vm15, %v1389_v24, %v1385_v40  ;;  %v1267_v40 = vadd.s32 4294967232, %v2429_v47 }
 0x130   :  { %v1093_v56 = vpop.xlane.xlu1 %1092  ;;  %v1069_v28 = vpop.xlane.xlu0 %1068 }
 0x131   :  { %v1506_v2 = vrot.slane %v1093_v56, %v2564_v33  ;;  %v1467_v19 = vrot.slane %v1069_v28, %v2596_v58  ;;  %v2950_v29 = vsub.s32 %v1267_v40, %v2440_v55 }
 0x133   :  { %v2935_v12 = vsel %vm627_vm12, %v1506_v2, %v1502_v48  ;;  %v1468_v23 = vsel %vm634_vm13, %v1467_v19, %v1463_v21 }
 0x134   :  { %v1117_v25 = vpop.xlane.xlu1 %1116  ;;  %v1114_v30 = vpop.xlane.xlu0 %1113 }
 0x135   :  { %v1545_v31 = vrot.slane %v1117_v25, %v2451_v0  ;;  %v1541_v10 = vrot.slane %v1114_v30, %v2455_v1 }
 0x137   :  { %v2941_v20 = vsel %vm177_vm4, %v1545_v31, %v1541_v10 }
 0x138   :  { %v537_v34 = vpop.xlane.xlu1 %536  ;;  %v528_v35 = vpop.xlane.xlu0 %527 }
 0x139   :  { %v705_v37 = vrot.slane %v537_v34, %v2564_v33  ;;  %v691_v38 = vrot.slane %v528_v35, %v2596_v58 }
 0x13b   :  { %v706_v41 = vsel %vm627_vm12, %v705_v37, %v701_v14  ;;  %v692_v45 = vsel %vm634_vm13, %v691_v38, %v687_v3 }
 0x13c   :  { %v771_v36 = vsel %vm246_vm7, %v692_v45, %v770_v42  ;;  %v546_v21 = vpop.xlane.xlu1 %545  ;;  %v543_v8 = vpop.xlane.xlu0 %542 }
 0x13d   :  { %v719_v25 = vrot.slane %v546_v21, %v2451_v0  ;;  %v715_v30 = vrot.slane %v543_v8, %v2455_v1 }
 0x13f   :  { %v720_v35 = vsel %vm177_vm4, %v719_v25, %v715_v30 }
 0x140   :  { %v976_v46 = vpop.xlane.xlu1 %975  ;;  %v949_v50 = vpop.xlane.xlu0 %948 }
 0x141   :  { %v1316_v51 = vrot.slane %v976_v46, %v2950_v29  ;;  %v1271_v32 = vrot.slane %v949_v50, %v2950_v29 }
 0x143   :  { %v1317_v52 = vsel %vm1272_vm0, %v1316_v51, %v1312_v13  ;;  %v1273_v48 = vsel %vm1272_vm0, %v1271_v32, %v1266_v11 }
 0x144   :  { %v1582_v54 = vsel %vm242_vm5, %v1317_v52, %v1273_v48  ;;  %v1024_v61 = vpop.xlane.xlu1 %1023  ;;  %v1000_v42 = vpop.xlane.xlu0 %999  ;;  %vm776_vm5 = vcmask 261120  }
 0x145   :  { %v1394_v49 = vrot.slane %v1024_v61, %v2868_v18  ;;  %v1355_v55 = vrot.slane %v1000_v42, %v2914_v63 }
 0x147   :  { %v1395_v3 = vsel %vm1258_vm1, %v1394_v49, %v1390_v27  ;;  %v1356_v4 = vsel %vm1265_vm3, %v1355_v55, %v1351_v44 }
 0x148   :  { %v1072_v5 = vpop.xlane.xlu1 %1071  ;;  %v1048_v6 = vpop.xlane.xlu0 %1047 }
 0x149   :  { %v1472_v7 = vrot.slane %v1072_v5, %v2658_v39  ;;  %v1433_v61 = vrot.slane %v1048_v6, %v2754_v53 }
 0x14b   :  { %v2963_v9 = vsel %vm1244_vm14, %v1472_v7, %v1468_v23  ;;  %v1434_v5 = vsel %vm1251_vm15, %v1433_v61, %v2929_v26 }
 0x14c   :  { %v2965_v11 = vpop.xlane.xlu1 %1119  ;;  %v2967_v14 = vpop.xlane.xlu0 %1095 }
 0x150   :  { %v549_v15 = vpop.xlane.xlu1 %548  ;;  %v540_v16 = vpop.xlane.xlu0 %539 }
 0x151   :  { %v710_v17 = vrot.slane %v540_v16, %v2596_v58  ;;  %v724_v31 = vrot.slane %v549_v15, %v2564_v33 }
 0x153   :  { %v711_v43 = vsel %vm634_vm13, %v710_v17, %v706_v41  ;;  %v725_v38 = vsel %vm627_vm12, %v724_v31, %v720_v35 }
 0x154   :  { %v772_v13 = vsel %vm248_vm8, %v711_v43, %v771_v36  ;;  %v558_v44 = vpop.xlane.xlu1 %557  ;;  %v555_v59 = vpop.xlane.xlu0 %554 }
 0x155   :  { %v738_v17 = vrot.slane %v558_v44, %v2451_v0  ;;  %v734_v6 = vrot.slane %v555_v59, %v2455_v1 }
 0x157   :  { %v739_v44 = vsel %vm177_vm4, %v738_v17, %v734_v6 }
 0x158   :  { %v1027_v62 = vpop.xlane.xlu1 %1026  ;;  %v1003_v22 = vpop.xlane.xlu0 %1002 }
 0x159   :  { %v1360_v24 = vrot.slane %v1003_v22, %v2950_v29  ;;  %v1399_v21 = vrot.slane %v1027_v62, %v2914_v63 }
 0x15b   :  { %v1361_v27 = vsel %vm1272_vm0, %v1360_v24, %v1356_v4  ;;  %v1400_v51 = vsel %vm1265_vm3, %v1399_v21, %v1395_v3 }
 0x15c   :  { %v1583_v56 = vsel %vm244_vm6, %v1361_v27, %v1582_v54  ;;  %v2975_v28 = vpop.xlane.xlu1 %1074  ;;  %v1051_v2 = vpop.xlane.xlu0 %1050 }
 0x15d   :  { %v1438_v55 = vrot.slane %v1051_v2, %v2868_v18 }
 0x15f   :  { %v1439_v15 = vsel %vm1258_vm1, %v1438_v55, %v1434_v5 }
 0x160   :  { %v2977_v19 = vpop.xlane.xlu1 %1122  ;;  %v2979_v23 = vpop.xlane.xlu0 %1098 }
 0x161   :  { %v1555_v55 = vrot.slane %v2977_v19, %v2596_v58 }
 0x164   :  { %v561_v10 = vpop.xlane.xlu1 %560  ;;  %v552_v34 = vpop.xlane.xlu0 %551 }
 0x165   :  { %v729_v37 = vrot.slane %v552_v34, %v2596_v58  ;;  %v1477_v34 = vrot.slane %v2975_v28, %v2754_v53 }
 0x167   :  { %v730_v40 = vsel %vm634_vm13, %v729_v37, %v725_v38 }
 0x168   :  { %v773_v41 = vsel %vm250_vm9, %v730_v40, %v772_v13  ;;  %v570_v45 = vpop.xlane.xlu1 %569  ;;  %v567_v36 = vpop.xlane.xlu0 %566  ;;  %v743_v13 = vrot.slane %v561_v10, %v2564_v33  ;;  %v1516_v40 = vrot.slane %v2979_v23, %v2658_v39 }
 0x169   :  { %v753_v2 = vrot.slane %v567_v36, %v2455_v1 }
 0x16a   :  { %v744_v25 = vsel %vm627_vm12, %v743_v13, %v739_v44 }
 0x16c   :  { %v1054_v46 = vpop.xlane.xlu1 %1053  ;;  %v1030_v8 = vpop.xlane.xlu0 %1029 }
 0x16d   :  { %v1404_v50 = vrot.slane %v1030_v8, %v2950_v29  ;;  %v1443_v4 = vrot.slane %v1054_v46, %v2914_v63 }
 0x16f   :  { %v1405_v32 = vsel %vm1272_vm0, %v1404_v50, %v1400_v51  ;;  %v1444_v43 = vsel %vm1265_vm3, %v1443_v4, %v1439_v15  ;;  %v1478_v50 = vsel %vm1251_vm15, %v1477_v34, %v2963_v9  ;;  %v1550_v9 = vrot.slane %v2965_v11, %v2564_v33 }
 0x170   :  { %v1584_v52 = vsel %vm246_vm7, %v1405_v32, %v1583_v56  ;;  %v1102_v48 = vpop.xlane.xlu1 %1101  ;;  %v1078_v54 = vpop.xlane.xlu0 %1077  ;;  %v757_v56 = vrot.slane %v570_v45, %v2451_v0  ;;  %v1511_v0 = vrot.slane %v2967_v14, %v2596_v58 }
 0x171   :  { %v1482_v1 = vrot.slane %v1078_v54, %v2868_v18  ;;  %v1521_v21 = vrot.slane %v1102_v48, %v2754_v53 }
 0x172   :  { %v758_v35 = vsel %vm177_vm4, %v757_v56, %v753_v2  ;;  %v1512_v23 = vsel %vm634_vm13, %v1511_v0, %v2935_v12  ;;  %v1679_v0 = vld [vmem:[%s3142_s9] sm:$0xff] }
 0x173   :  { %v1517_v61 = vsel %vm1244_vm14, %v1516_v40, %v1512_v23  ;;  %v1681_v40 = vld [vmem:[%s3142_s9 + $0x10] sm:$0xff] }
 0x174   :  { %v564_v42 = vpop.xlane.xlu1 %563  ;;  %v2995_v49 = vpop.xlane.xlu0 %1125  ;;  %v1522_v12 = vsel %vm1251_vm15, %v1521_v21, %v1517_v61  ;;  %v1684_v21 = vld [vmem:[%s3142_s9 + $0x28] sm:$0xff] }
 0x175   :  { %v748_v22 = vrot.slane %v564_v42, %v2596_v58 }
 0x177   :  { %v749_v30 = vsel %vm634_vm13, %v748_v22, %v744_v25 }
 0x178   :  { %v1057_v7 = vpop.xlane.xlu1 %1056  ;;  %v573_v3 = vpop.xlane.xlu0 %572  ;;  %v774_v45 = vsel %vm252_vm10, %v749_v30, %v773_v41  ;;  %v1483_v41 = vsel %vm1258_vm1, %v1482_v1, %v1478_v50  ;;  %v1680_v1 = vld [vmem:[%s3142_s9 + $0x8] sm:$0xff] }
 0x179   :  { %v1448_v16 = vrot.slane %v1057_v7, %v2950_v29  ;;  %v762_v59 = vrot.slane %v573_v3, %v2564_v33  ;;  %v1560_v7 = vrot.slane %v2995_v49, %v2658_v39 }
 0x17b   :  { %v1449_v62 = vsel %vm1272_vm0, %v1448_v16, %v1444_v43  ;;  %v763_v38 = vsel %vm627_vm12, %v762_v59, %v758_v35 }
 0x17c   :  { %v1585_v26 = vsel %vm248_vm8, %v1449_v62, %v1584_v52  ;;  %v1105_v24 = vpop.xlane.xlu1 %1104  ;;  %v1081_v27 = vpop.xlane.xlu0 %1080 }
 0x17d   :  { %v1487_v36 = vrot.slane %v1081_v27, %v2914_v63  ;;  %v1526_v51 = vrot.slane %v1105_v24, %v2868_v18 }
 0x17f   :  { %v1488_v42 = vsel %vm1265_vm3, %v1487_v36, %v1483_v41  ;;  %v1527_v3 = vsel %vm1258_vm1, %v1526_v51, %v1522_v12  ;;  %v1777_v51 = vld [vmem:[%s3143_s10] sm:$0xff] }
 0x180   :  { %v576_v31 = vpop.xlane.xlu1 %575  ;;  %v1129_v10 = vpop.xlane.xlu0 %1128 }
 0x181   :  { %v767_v37 = vrot.slane %v576_v31, %v2596_v58  ;;  %v1565_v16 = vrot.slane %v1129_v10, %v2754_v53  ;;  %v1551_v58 = vsel %vm627_vm12, %v1550_v9, %v2941_v20 }
 0x182   :  { %v1556_v39 = vsel %vm634_vm13, %v1555_v55, %v1551_v58 }
 0x183   :  { %v768_v28 = vsel %vm634_vm13, %v767_v37, %v763_v38  ;;  %v1561_v13 = vsel %vm1244_vm14, %v1560_v7, %v1556_v39  ;;  %v1940_v38 = vpack.c.bf16 %v1680_v1, %v1679_v0 }
 0x184   :  { %v325_v46 = vpop.f32.mrb[0].mxu0  ;;  %v1108_v8 = vpop.xlane.xlu1 %1107  ;;  %v775_v14 = vsel %vm254_vm11, %v768_v28, %v774_v45  ;;  %v1566_v53 = vsel %vm1251_vm15, %v1565_v16, %v1561_v13  ;;  %v1682_v45 = vld [vmem:[%s3142_s9 + $0x18] sm:$0xff]  ;;  %v1683_v28 = vld [vmem:[%s3142_s9 + $0x20] sm:$0xff] }
 0x185   :  { %v1084_v32 = vpop.xlane.xlu0 %1083  ;;  %v1861_v52 = vpop.f32.mrb[1].mxu0  ;;  %1876 = vmatmul.mubr.msk.f32.vlgmr.msra.gmra.mrb[2].mxu1 %vm776_vm5, %v775_v14  ;;  %v1531_v54 = vrot.slane %v1108_v8, %v2914_v63  ;;  %v1943_v36 = vpack.c.bf16 %v1682_v45, %v1681_v40  ;;  %v1685_v8 = vld [vmem:[%s3142_s9 + $0x30] sm:$0xff]  ;;  %v1686_v14 = vld [vmem:[%s3142_s9 + $0x38] sm:$0xff]  ;;  %s1963_s9 = scalar_lea.vmem %s1807_s4, 128 }
 0x186   :  { %v1492_v48 = vrot.slane %v1084_v32, %v2950_v29  ;;  %1915 = vmatprep.mubr.msk.f32.mxu1 %vm2012_vm2, %v2013_v60  ;;  %vm1589_vm2 = vcmask 588800   ;;  %1941 = vmatpush3.bf16.msra.mxu1 %v1940_v38  ;;  %v1949_v50 = vpack.c.bf16 %v1686_v14, %v1685_v8  ;;  %v2014_v32 = vmov 0   ;;  %p1964_p0 = scmp.ne.s32.totalorder %s1807_s4, %s1963_s9  ;;  %p1969_p2 = scmp.lt.s32.totalorder %s1963_s9, %s1963_s9 }
 0x187   :  { %v1532_v17 = vsel %vm1265_vm3, %v1531_v54, %v1527_v3  ;;  %1942 = vmatprep.subr.bf16.mxu1 %v2011_v57  ;;  %1957 = vset.pattern.permute.xlu1 %v2014_v32 }
 0x188   :  { %v1493_v4 = vsel %vm1272_vm0, %v1492_v48, %v1488_v42  ;;  %v1111_v5 = vpop.xlane.xlu1 %1110  ;;  %1958 = vset.pattern.permute.xlu0 %v2014_v32  ;;  %1779 = vperm.xlu1 %1957, %v1777_v51   ;;  %p1970_p3 = por %p1969_p2, %p1968_p1 }
 0x189   :  { %v1586_v15 = vsel %vm250_vm9, %v1493_v4, %v1585_v26  ;;  %v1536_v33 = vrot.slane %v1111_v5, %v2950_v29  ;;  %v1132_v11 = vpop.xlane.xlu0 %1131 }
 0x18a   :  { %v1570_v6 = vrot.slane %v1132_v11, %v2868_v18  ;;  %1944 = vmatpush3.bf16.msra.mxu1 %v1943_v36  ;;  %p1971_p4 = pnand %p1970_p3, %p1964_p0 }
 0x18b   :  { %v1537_v19 = vsel %vm1272_vm0, %v1536_v33, %v1532_v17  ;;  %1945 = vmatprep.subr.bf16.mxu1 %v2011_v57 }
 0x18c   :  { %v1587_v49 = vsel %vm252_vm10, %v1537_v19, %v1586_v15  ;;  %v1138_v43 = vpop.xlane.xlu1 %1137  ;;  %v1571_v20 = vsel %vm1258_vm1, %v1570_v6, %v1566_v53 }
 0x18d   :  { %v1135_v62 = vpop.xlane.xlu0 %1134  ;;  %v1580_v22 = vrot.slane %v1138_v43, %v2950_v29 }
 0x18e   :  { %v1575_v26 = vrot.slane %v1135_v62, %v2914_v63  ;;  %v1822_v63 = vld [vmem:[%s3141_s8] ss:$0 sm:$0xff] }
 0x190   :  { %v1576_v24 = vsel %vm1265_vm3, %v1575_v26, %v1571_v20  ;;  %vm3148_vm3 = vcmask 523264  }
 0x191   :  { %v1581_v18 = vsel %vm1272_vm0, %v1580_v22, %v1576_v24  ;;  %vm3149_vm0 = vmmov %vm3148_vm3 }
 0x192   :  { %v1588_v27 = vsel %vm254_vm11, %v1581_v18, %v1587_v49  ;;  %vm3150_vm4 = vmmov %vm3149_vm0 }
 0x193   :  { %1897 = vmatmul.mubr.msk.f32.vlgmr.msra.gmra.mrb[2].mxu0 %vm1589_vm2, %v1588_v27 }
 0x1d7   :  { %v445_v56 = vpop.f32.mrb[0].mxu1 }
 0x1d8   :  { %v446_v2 = vadd.f32 %v445_v56, %v325_v46  ;;  %v1866_v44 = vpop.f32.mrb[1].mxu1  ;;  %v1946_v46 = vpack.c.bf16 %v1684_v21, %v1683_v28 }
 0x1da   :  { %1947 = vmatpush3.bf16.msra.mxu1 %v1946_v46 }
 0x1db   :  { %1948 = vmatprep.subr.bf16.mxu1 %v2011_v57 }
 0x1de   :  { %1950 = vmatpush3.bf16.msra.mxu1 %v1949_v50 }
 0x258   :  { %v845_v59 = vpop.f32.mrb[2].mxu1 }
 0x259   :  { %v849_v25 = vadd.f32 %v845_v59, %v446_v2  ;;  %v1877_v29 = vpop.f32.mrb[3].mxu1 }
 0x266   :  { %v1658_v30 = vpop.f32.mrb[2].mxu0 }
 0x267   :  { %v1662_v31 = vadd.f32 %v1658_v30, %v849_v25  ;;  %v1898_v10 = vpop.f32.mrb[3].mxu0 }
 0x269   :  { %v1670_v34 = vadd.f32 %v1822_v63, %v1662_v31 }
 0x26b   :  { %1671 = vst.msk [vmem:[#allocation4] sm:$0xff] %vm3148_vm3, %v1670_v34  ;;  %v1672_v35 = vmul.f32 %v1670_v34, %v1670_v34 }
 0x26d   :  { %v1673_v37 = vsel %vm3149_vm0, %v1672_v35, 0.0 }
 0x26e   :  { %1674 = vadd.xlane.f32.xlu0 %v1673_v37 }
 0x2fb   :  { %v1675_v52 = vpop.xlane.xlu0 %1674 }
 0x2fc   :  { %v1676_v57 = vmax.f32 %v1675_v52, 1e-24 }
 0x2fe   :  { %1959 = vrsqrt.f32 %v1676_v57 }
 0x308   :  { %v1960_v23 = vpop.eup %1959 }
 0x309   :  { %v1678_v41 = vmul.f32 %v1960_v23, %v1670_v34 }
 0x30b   :  { %1916 = vmatmul.mubr.msk.f32.vlgmr.msra.gmra.mrb[4].mxu1 %vm3150_vm4, %v1678_v41 }
 0x30c   :  { %1974 = shalt.err (!%p1971_p4)
}
 0x30d   :  { %s1975_s26 = scalar_lea.hbm %s3145_s12, 128 }
 0x30e   :  { %p1976_p5 = scmp.ne.s32.totalorder %s3145_s12, %s1975_s26  ;;  %p1979_p6 = scmp.lt.u32.totalorder %s1975_s26, %s3145_s12 }
 0x310   :  { %p1981_p7 = pnand %p1979_p6, %p1976_p5 }
 0x312   :  { %1984 = shalt.err (!%p1981_p7)
}
 0x313   :  { %1809 = dma.vmem_to_hbm [thread:$0]  %s1807_s4, 128, %s3145_s12, [#allocation5]   ;;  %v1780_v12 = vpop.permute.xlu1 %1779  ;;  %vm3151_vm10 = vcmask 130048  }
 0x314   :  { %vm1781_vm6 = vcmp.eq.s32.totalorder %v2429_v47, %v1780_v12  ;;  %s2016_s12 = smov [#allocation2]  }
 0x315   :  { %v1825_v3 = vsel %vm1781_vm6, 1.0, %v2013_v60  ;;  %s1796_s30 = sshll.u32 %s2016_s12, 4  ;;  %s1797_s30 = int_to_ptr.vmem [resolvable:$true] %s1796_s30 }
 0x316   :  { %v1785_v17 = vsub.f32 1.0, %v1825_v3  ;;  %s1985_s13 = scalar_lea.vmem %s1797_s30, 128  ;;  %p1990_p9 = scmp.lt.s32.totalorder %s1797_s30, %s1797_s30 }
 0x317   :  { %p1986_p8 = scmp.ne.s32.totalorder %s1797_s30, %s1985_s13  ;;  %p1991_p10 = scmp.lt.s32.totalorder %s1985_s13, %s1985_s13 }
 0x319   :  { %p1992_p11 = por %p1991_p10, %p1990_p9 }
 0x31b   :  { %p1993_p12 = pnand %p1992_p11, %p1986_p8 }
 0x3de   :  { %v1756_v54 = vpop.f32.mrb[4].mxu1 }
 0x3df   :  { %v1760_v48 = vmul.f32 %v1756_v54, %v1756_v54  ;;  %v1917_v9 = vpop.f32.mrb[5].mxu1  ;;  %v1771_v11 = vmul.f32 0.87758255, %v1756_v54  ;;  %v1824_v58 = vadd.f32 -0.23971277, %v1756_v54  ;;  %v1786_v49 = vmul.f32 %v1785_v17, %v1756_v54 }
 0x3e0   :  { %vm1774_vm9 = vcmp.gt.f32.partialorder %v1756_v54, -0.87758255 }
 0x3e1   :  { %v1761_v61 = vsub.f32 1.0, %v1760_v48 }
 0x3e3   :  { %v1762_v42 = vmax.f32 %v1761_v61, 0.0 }
 0x3e5   :  { %v1763_v55 = vmin.f32 %v1762_v42, 1.0 }
 0x3e7   :  { %1961 = vrsqrt.f32 %v1763_v55  ;;  %vm1766_vm7 = vcmp.eq.f32.partialorder %v1763_v55, inf  ;;  %v1769_v7 = vand.u32 2147483648, %v1763_v55  ;;  %vm1768_vm8 = vcmp.eq.f32.partialorder %v1763_v55, 0.0 }
 0x3f1   :  { %v1962_v4 = vpop.eup %1961 }
 0x3f2   :  { %v1765_v5 = vmul.f32 %v1962_v4, %v1763_v55 }
 0x3f4   :  { %v1767_v15 = vsel %vm1766_vm7, %v1763_v55, %v1765_v5 }
 0x3f5   :  { %v1770_v33 = vsel %vm1768_vm8, %v1769_v7, %v1767_v15 }
 0x3f6   :  { %v1772_v16 = vmul.f32 0.47942555, %v1770_v33 }
 0x3f8   :  { %v1773_v19 = vsub.f32 %v1771_v11, %v1772_v16 }
 0x3fa   :  { %v1776_v6 = vsel %vm1774_vm9, %v1773_v19, %v1824_v58 }
 0x3fb   :  { %v1784_v39 = vmul.f32 %v1825_v3, %v1776_v6 }
 0x3fd   :  { %v1787_v47 = vadd.f32 %v1786_v49, %v1784_v39 }
 0x3ff   :  { %v1788_v43 = vmul.f32 30.0, %v1787_v47 }
 0x401   :  { %1789 = vst.msk [vmem:[#allocation2] sm:$0xff] %vm3151_vm10, %v1788_v43 }
 0x402   :  { %1996 = shalt.err (!%p1993_p12)
}
 0x403   :  { %s1997_s15 = scalar_lea.hbm %s3144_s11, 128 }
 0x404   :  { %p1998_p13 = scmp.ne.s32.totalorder %s3144_s11, %s1997_s15  ;;  %p2001_p0 = scmp.lt.u32.totalorder %s1997_s15, %s3144_s11 }
 0x406   :  { %p2003_p1 = pnand %p2001_p0, %p1998_p13 }
 0x408   :  { %2006 = shalt.err (!%p2003_p1)
}
 0x409   :  { %1799 = dma.vmem_to_hbm [thread:$0]  %s1797_s30, 128, %s3144_s11, [#allocation3]  }
 0x40a   :  { %2007 = dma.done.wait [#allocation3], 128  }
 0x40b   :  { %2008 = vsyncadd [#allocation3], 4294967168 }
 0x40c   :  { %2009 = dma.done.wait [#allocation5], 128  }
 0x40d   :  { %2010 = vsyncadd [#allocation5], 4294967168 }
 0x40e   :  { %1816 = vsyncpa [#allocation3], 1 }
 0x40f   :  { %1817 = vsyncpa [#allocation5], 1 }

</bundles_post_ra>
